<compile_context>
chip_gen: v5e
topology: v5e:2x2
jax: 0.10.0
libtpu: 0.0.40
codegen_flags: <defaults>
</compile_context>

<pallas_src>
import functools
from typing import NamedTuple

import numpy as np
import jax
import jax.numpy as jnp
from jax import lax
from jax.experimental import pallas as pl
from jax.experimental.pallas import tpu as pltpu


# ----------------------------------------------------------------------------
# Network configuration helpers (match the PyTorch module).
# ----------------------------------------------------------------------------
def make_layer_configs(in_channels, num_channels):
    """Per-layer (cin, cout, stride, apply_silu)."""
    cfgs = [(in_channels, num_channels[0], 1, True)]                    # conv_in
    for i in range(len(num_channels) - 1):
        cfgs.append((num_channels[i], num_channels[i], 1, True))        # stride-1 block
        cfgs.append((num_channels[i], num_channels[i + 1], 2, True))    # stride-2 block
    cfgs.append((num_channels[-1], num_channels[-1], 1, False))         # conv_out
    return cfgs


def init_conv_params(key, cout, cin, k=3):
    """Deterministic synthetic weights, PyTorch-Conv2d-style uniform bounds.

    Weights are rounded to bf16-representable f32 values so the kernel's
    bf16 structured-weight storage is exact (no precision loss vs reference).
    """
    kw, kb = jax.random.split(key)
    bound = 1.0 / (cin * k * k) ** 0.5
    w = jax.random.uniform(kw, (cout, cin, k, k), jnp.float32, -bound, bound)
    b = jax.random.uniform(kb, (cout,), jnp.float32, -bound, bound)
    w = w.astype(jnp.bfloat16).astype(jnp.float32)
    return w, b


def _round_up(x, m):
    return (x + m - 1) // m * m


def _layer_geoms(configs, H, W):
    """Per-layer spatial geometry: (Hi, Wi, Ho, Wo, Cin, Cout, stride, act)."""
    geoms, h, w = [], H, W
    for (cin, cout, stride, act) in configs:
        ho = (h + 2 - 3) // stride + 1
        wo = (w + 2 - 3) // stride + 1
        geoms.append((h, w, ho, wo, cin, cout, stride, act))
        h, w = ho, wo
    return geoms


class KernelSpec(NamedTuple):
    B: int
    Cin: int
    H: int
    W: int
    rows: int
    lanes: int
    out_rows: int
    out_hwc: tuple          # (Ho_final, Wo_final, Cout_final)
    layer_meta: tuple       # per layer: (hi, ho, stride, act, s2_idx)


# ----------------------------------------------------------------------------
# Host-side weight preprocessing.
#   activation layout: A[b*H + h, w*C + c]                   (rows x lanes)
#   per layer:   A_out = SiLU( [shift_ky0 | shift_ky1 | shift_ky2] @ Wcat + b )
# where the ky row shifts are sublane rolls (stride 1) or tiny 0/1 matmuls
# (stride 2), and Wcat folds the kx taps, W-stride and W zero padding.
# ----------------------------------------------------------------------------
def build_structured_params(params, configs, B, H, W):
    geoms = _layer_geoms(configs, H, W)
    L = len(configs)
    Cin = configs[0][0]

    rows = B * H
    assert rows % 8 == 0, "B*H must be sublane (8) aligned for this kernel"
    lanes = _round_up(
        max(max(wi * ci, wo * co) for (_, wi, _, wo, ci, co, _, _) in geoms), 128)

    Wcat = np.zeros((L, 3 * lanes, lanes), np.float32)   # merged 3-ky structured weights
    Bv = np.zeros((L, 1, lanes), np.float32)             # bias tiled over output width
    s2_list = []                                         # stride-2 row-selection matrices
    layer_meta = []

    for l, ((wgt, bias), (hi, wi, ho, wo, cin, cout, stride, act)) in enumerate(
            zip(params, geoms)):
        wt = np.transpose(np.asarray(wgt, np.float32), (2, 3, 1, 0))  # (ky, kx, cin, cout)
        for ky in range(3):
            for kx in range(3):
                for j in range(wo):
                    wsrc = stride * j + kx - 1
                    if 0 <= wsrc < wi:
                        Wcat[l,
                             ky * lanes + wsrc * cin: ky * lanes + (wsrc + 1) * cin,
                             j * cout:(j + 1) * cout] = wt[ky, kx]
        Bv[l, 0, :wo * cout] = np.tile(np.asarray(bias, np.float32), wo)

        s2_idx = -1
        if stride == 2:
            s2_idx = len(s2_list)
            s = np.zeros((3, rows, rows), np.float32)
            for ky in range(3):
                for b in range(B):
                    for i in range(ho):
                        hsrc = 2 * i + ky - 1
                        if 0 <= hsrc < hi:
                            s[ky, b * ho + i, b * hi + hsrc] = 1.0
            s2_list.append(s)
        layer_meta.append((hi, ho, stride, act, s2_idx))

    S2 = (np.stack(s2_list, axis=0) if s2_list
          else np.zeros((1, 3, rows, rows), np.float32))

    # NCHW -> lane-dense fold (pure 0/1 permutation, exact in bf16):
    #   A1[b*H + y, x*Cin + c] = sum_c X[(b*Cin + c)*H + y, x] * Spread[c, x, :]
    Spread = np.zeros((Cin, W, lanes), np.float32)
    for c in range(Cin):
        for x in range(W):
            Spread[c, x, x * Cin + c] = 1.0

    hf, wf, cf = geoms[-1][2], geoms[-1][3], geoms[-1][5]
    out_rows = B * hf
    assert out_rows % 8 == 0, "B*Ho_final must be sublane (8) aligned"

    spec = KernelSpec(B, Cin, H, W, rows, lanes, out_rows, (hf, wf, cf),
                      tuple(layer_meta))
    return (jnp.asarray(Spread, jnp.bfloat16),    # exact (0/1)
            jnp.asarray(S2, jnp.bfloat16),        # exact (0/1)
            jnp.asarray(Wcat, jnp.bfloat16),      # exact (weights pre-rounded to bf16)
            jnp.asarray(Bv, jnp.float32),
            spec)


# ----------------------------------------------------------------------------
# The fused Pallas kernel: whole network, one invocation, everything in VMEM.
# ----------------------------------------------------------------------------
def _fused_kernel(x_ref, spread_ref, s2_ref, w_ref, b_ref, o_ref, *, spec):
    f32 = jnp.float32
    B, Cin, H = spec.B, spec.Cin, spec.H
    rows, lanes = spec.rows, spec.lanes
    rid = lax.broadcasted_iota(jnp.int32, (rows, lanes), 0)

    # ---- fold the NCHW input into the lane-dense slab (no XLA-side transpose) ----
    #   h[b*H + y, x*Cin + c] = x_nchw[b, c, y, x]
    h = jnp.zeros((rows, lanes), f32)
    for c in range(Cin):
        xc = jnp.concatenate(
            [x_ref[pl.ds((b * Cin + c) * H, H), :] for b in range(B)], axis=0)
        h = h + jnp.dot(xc, spread_ref[c].astype(f32), preferred_element_type=f32)

    # ---- the six conv(+SiLU) layers, all VMEM / vreg resident ----
    for l, (hi, ho, stride, act, s2_idx) in enumerate(spec.layer_meta):
        if stride == 1:
            # ky row taps via XLU sublane rolls + image-edge masks (zero pad).
            up = pltpu.roll(h, 1, axis=0)            # out row r <- in row r-1 (ky=0)
            dn = pltpu.roll(h, rows - 1, axis=0)     # out row r <- in row r+1 (ky=2)
            p0 = jnp.where((rid % hi) != 0, up, 0.0)
            p1 = h
            p2 = jnp.where((rid % hi) != hi - 1, dn, 0.0)
        else:
            # stride-2 row downsample (+H zero pad) via tiny 0/1 matmuls.
            p0 = jnp.dot(s2_ref[s2_idx, 0].astype(f32), h, preferred_element_type=f32)
            p1 = jnp.dot(s2_ref[s2_idx, 1].astype(f32), h, preferred_element_type=f32)
            p2 = jnp.dot(s2_ref[s2_idx, 2].astype(f32), h, preferred_element_type=f32)

        # Merged 3-tap contraction: one lane-dense (rows,3*lanes)@(3*lanes,lanes) dot.
        hcat = jnp.concatenate([p0, p1, p2], axis=1)
        acc = jnp.dot(hcat, w_ref[l].astype(f32), preferred_element_type=f32)
        acc = acc + b_ref[l]
        if act:
            # SiLU: exp + reciprocal land on the EUP slot; exact (approx=False)
            # to stay within the 2e-4 f32 reference tolerance.
            acc = acc * pl.reciprocal(1.0 + jnp.exp(-acc), approx=False)
        if B * ho < rows:
            # Keep rows beyond the valid B*ho image rows exactly zero
            # (masks the bias/SiLU garbage flagged in the review).
            acc = jnp.where(rid < B * ho, acc, 0.0)
        h = acc

    hf, wf, cf = spec.out_hwc
    o_ref[...] = h[:spec.out_rows, :wf * cf]


def conditioning_embedding_pallas(x_nchw, spread, s2, wcat, bias, spec):
    B, Cin, H, W = x_nchw.shape
    assert (B, Cin, H, W) == (spec.B, spec.Cin, spec.H, spec.W)

    # Free (metadata-only) collapse of the contiguous NCHW tensor; the actual
    # NCHW -> channels-last layout change is folded into the kernel's matmuls.
    x2d = x_nchw.reshape(B * Cin * H, W)

    hf, wf, cf = spec.out_hwc
    L = len(spec.layer_meta)
    n_act = sum(1 for m in spec.layer_meta if m[3])
    n_s2 = sum(1 for m in spec.layer_meta if m[2] == 2)
    flops = (2 * spec.rows * (3 * spec.lanes) * spec.lanes * L
             + 2 * spec.rows * spec.rows * spec.lanes * 3 * n_s2
             + 2 * spec.rows * W * spec.lanes * Cin)
    bytes_accessed = (sum(int(a.size) * a.dtype.itemsize
                          for a in (x2d, spread, s2, wcat, bias))
                      + spec.out_rows * wf * cf * 4)

    vmem = pl.BlockSpec(memory_space=pltpu.MemorySpace.VMEM)
    out2d = pl.pallas_call(
        functools.partial(_fused_kernel, spec=spec),
        out_shape=jax.ShapeDtypeStruct((spec.out_rows, wf * cf), jnp.float32),
        in_specs=[vmem, vmem, vmem, vmem, vmem],
        out_specs=vmem,
        cost_estimate=pl.CostEstimate(flops=flops,
                                      transcendentals=spec.rows * spec.lanes * n_act,
                                      bytes_accessed=bytes_accessed),
    )(x2d, spread, s2, wcat, bias)

    # TODO(synk): the only residual XLA-side layout op — a ~4 KiB NHWC->NCHW
    # transpose to match the PyTorch module's BCHW output convention.
    out = out2d.reshape(B, hf, wf, cf)
    return jnp.transpose(out, (0, 3, 1, 2))


# ----------------------------------------------------------------------------
# Pure-JAX reference (same math as the PyTorch module).
# ----------------------------------------------------------------------------
def conditioning_embedding_ref(x_nchw, params, configs):
    x = x_nchw
    for (w, b), (_, _, stride, act) in zip(params, configs):
        y = lax.conv_general_dilated(
            x, w, window_strides=(stride, stride),
            padding=((1, 1), (1, 1)),
            dimension_numbers=("NCHW", "OIHW", "NCHW"),
            precision=lax.Precision.HIGHEST)
        y = y + b.reshape(1, -1, 1, 1)
        if act:
            y = y * jax.nn.sigmoid(y)
        x = y
    return x


if __name__ == "__main__":
    B, Cin, H, W = 2, 4, 16, 16
    num_channels = (8, 16, 32)

    key = jax.random.PRNGKey(0)
    keys = jax.random.split(key, 1 + 6)
    x = jax.random.normal(keys[0], (B, Cin, H, W), jnp.float32)

    configs = make_layer_configs(Cin, num_channels)
    params = [init_conv_params(k, cout, cin)
              for k, (cin, cout, _, _) in zip(keys[1:], configs)]

    spread, s2, wcat, bias, spec = build_structured_params(params, configs, B, H, W)

    fwd = jax.jit(functools.partial(conditioning_embedding_pallas, spec=spec))
    out = jax.block_until_ready(fwd(x, spread, s2, wcat, bias))

    ref = conditioning_embedding_ref(x, params, configs)
    assert out.shape == (B, num_channels[-1], H // 4, W // 4), out.shape
    max_err = float(jnp.max(jnp.abs(out - ref)))
    assert jnp.allclose(out, ref, rtol=2e-4, atol=2e-4), max_err

    print("KERNEL_OK")
</pallas_src>

<mosaic_0001>
module attributes {stable_mosaic.version = 11 : i64} {
  func.func @_fused_kernel(%arg0: memref<128x16xf32, #tpu.memory_space<vmem>>, %arg1: memref<4x16x128xbf16, #tpu.memory_space<vmem>>, %arg2: memref<2x3x32x32xbf16, #tpu.memory_space<vmem>>, %arg3: memref<6x384x128xbf16, #tpu.memory_space<vmem>>, %arg4: memref<6x1x128xf32, #tpu.memory_space<vmem>>, %arg5: memref<8x128xf32, #tpu.memory_space<vmem>>) attributes {dimension_semantics = [], scalar_prefetch = 0 : i64, scratch_operands = 0 : i64, tpu.core_type = #tpu.core_type<tc>} {
    %0 = tpu.iota {dimensions = array<i32: 0>} : vector<32x128xi32>
    %cst = arith.constant 0.000000e+00 : f32
    %1 = vector.broadcast %cst : f32 to vector<32x128xf32>
    %c0 = arith.constant 0 : index
    %c0_0 = arith.constant 0 : index
    %2 = vector.load %arg0[%c0, %c0_0] : memref<128x16xf32, #tpu.memory_space<vmem>>, vector<16x16xf32>
    %c64 = arith.constant 64 : index
    %c0_1 = arith.constant 0 : index
    %3 = vector.load %arg0[%c64, %c0_1] : memref<128x16xf32, #tpu.memory_space<vmem>>, vector<16x16xf32>
    %4 = tpu.concatenate %2, %3 in 0 : vector<16x16xf32>, vector<16x16xf32> -> vector<32x16xf32>
    %c0_2 = arith.constant 0 : index
    %c0_3 = arith.constant 0 : index
    %c0_4 = arith.constant 0 : index
    %5 = vector.load %arg1[%c0_2, %c0_3, %c0_4] : memref<4x16x128xbf16, #tpu.memory_space<vmem>>, vector<1x16x128xbf16>
    %6 = vector.shape_cast %5 : vector<1x16x128xbf16> to vector<16x128xbf16>
    %7 = arith.extf %6 : vector<16x128xbf16> to vector<16x128xf32>
    %cst_5 = arith.constant dense<0.000000e+00> : vector<32x128xf32>
    %8 = tpu.matmul %4, %7, %cst_5 {dimension_numbers = #tpu.dot_dimension_numbers<[1], [0], [0], [1], [0, 0, 1, 1], [], []>} : vector<32x16xf32>, vector<16x128xf32>, vector<32x128xf32> -> vector<32x128xf32>
    %9 = arith.addf %1, %8 : vector<32x128xf32>
    %c16 = arith.constant 16 : index
    %c0_6 = arith.constant 0 : index
    %10 = vector.load %arg0[%c16, %c0_6] : memref<128x16xf32, #tpu.memory_space<vmem>>, vector<16x16xf32>
    %c80 = arith.constant 80 : index
    %c0_7 = arith.constant 0 : index
    %11 = vector.load %arg0[%c80, %c0_7] : memref<128x16xf32, #tpu.memory_space<vmem>>, vector<16x16xf32>
    %12 = tpu.concatenate %10, %11 in 0 : vector<16x16xf32>, vector<16x16xf32> -> vector<32x16xf32>
    %c1 = arith.constant 1 : index
    %c0_8 = arith.constant 0 : index
    %c0_9 = arith.constant 0 : index
    %13 = vector.load %arg1[%c1, %c0_8, %c0_9] : memref<4x16x128xbf16, #tpu.memory_space<vmem>>, vector<1x16x128xbf16>
    %14 = vector.shape_cast %13 : vector<1x16x128xbf16> to vector<16x128xbf16>
    %15 = arith.extf %14 : vector<16x128xbf16> to vector<16x128xf32>
    %cst_10 = arith.constant dense<0.000000e+00> : vector<32x128xf32>
    %16 = tpu.matmul %12, %15, %cst_10 {dimension_numbers = #tpu.dot_dimension_numbers<[1], [0], [0], [1], [0, 0, 1, 1], [], []>} : vector<32x16xf32>, vector<16x128xf32>, vector<32x128xf32> -> vector<32x128xf32>
    %17 = arith.addf %9, %16 : vector<32x128xf32>
    %c32 = arith.constant 32 : index
    %c0_11 = arith.constant 0 : index
    %18 = vector.load %arg0[%c32, %c0_11] : memref<128x16xf32, #tpu.memory_space<vmem>>, vector<16x16xf32>
    %c96 = arith.constant 96 : index
    %c0_12 = arith.constant 0 : index
    %19 = vector.load %arg0[%c96, %c0_12] : memref<128x16xf32, #tpu.memory_space<vmem>>, vector<16x16xf32>
    %20 = tpu.concatenate %18, %19 in 0 : vector<16x16xf32>, vector<16x16xf32> -> vector<32x16xf32>
    %c2 = arith.constant 2 : index
    %c0_13 = arith.constant 0 : index
    %c0_14 = arith.constant 0 : index
    %21 = vector.load %arg1[%c2, %c0_13, %c0_14] : memref<4x16x128xbf16, #tpu.memory_space<vmem>>, vector<1x16x128xbf16>
    %22 = vector.shape_cast %21 : vector<1x16x128xbf16> to vector<16x128xbf16>
    %23 = arith.extf %22 : vector<16x128xbf16> to vector<16x128xf32>
    %cst_15 = arith.constant dense<0.000000e+00> : vector<32x128xf32>
    %24 = tpu.matmul %20, %23, %cst_15 {dimension_numbers = #tpu.dot_dimension_numbers<[1], [0], [0], [1], [0, 0, 1, 1], [], []>} : vector<32x16xf32>, vector<16x128xf32>, vector<32x128xf32> -> vector<32x128xf32>
    %25 = arith.addf %17, %24 : vector<32x128xf32>
    %c48 = arith.constant 48 : index
    %c0_16 = arith.constant 0 : index
    %26 = vector.load %arg0[%c48, %c0_16] : memref<128x16xf32, #tpu.memory_space<vmem>>, vector<16x16xf32>
    %c112 = arith.constant 112 : index
    %c0_17 = arith.constant 0 : index
    %27 = vector.load %arg0[%c112, %c0_17] : memref<128x16xf32, #tpu.memory_space<vmem>>, vector<16x16xf32>
    %28 = tpu.concatenate %26, %27 in 0 : vector<16x16xf32>, vector<16x16xf32> -> vector<32x16xf32>
    %c3 = arith.constant 3 : index
    %c0_18 = arith.constant 0 : index
    %c0_19 = arith.constant 0 : index
    %29 = vector.load %arg1[%c3, %c0_18, %c0_19] : memref<4x16x128xbf16, #tpu.memory_space<vmem>>, vector<1x16x128xbf16>
    %30 = vector.shape_cast %29 : vector<1x16x128xbf16> to vector<16x128xbf16>
    %31 = arith.extf %30 : vector<16x128xbf16> to vector<16x128xf32>
    %cst_20 = arith.constant dense<0.000000e+00> : vector<32x128xf32>
    %32 = tpu.matmul %28, %31, %cst_20 {dimension_numbers = #tpu.dot_dimension_numbers<[1], [0], [0], [1], [0, 0, 1, 1], [], []>} : vector<32x16xf32>, vector<16x128xf32>, vector<32x128xf32> -> vector<32x128xf32>
    %33 = arith.addf %25, %32 : vector<32x128xf32>
    %c1_i32 = arith.constant 1 : i32
    %34 = tpu.dynamic_rotate %33 by %c1_i32 dim 0 : vector<32x128xf32>, i32 -> vector<32x128xf32>
    %c31_i32 = arith.constant 31 : i32
    %35 = tpu.dynamic_rotate %33 by %c31_i32 dim 0 : vector<32x128xf32>, i32 -> vector<32x128xf32>
    %c16_i32 = arith.constant 16 : i32
    %c0_i32 = arith.constant 0 : i32
    %36 = arith.cmpi eq, %c16_i32, %c0_i32 : i32
    %c1_i32_21 = arith.constant 1 : i32
    %37 = arith.select %36, %c1_i32_21, %c16_i32 : i32
    %38 = vector.broadcast %37 : i32 to vector<32x128xi32>
    %39 = arith.remsi %0, %38 : vector<32x128xi32>
    %c0_i32_22 = arith.constant 0 : i32
    %40 = vector.broadcast %c0_i32_22 : i32 to vector<32x128xi32>
    %41 = arith.cmpi ne, %39, %40 : vector<32x128xi32>
    %c0_i32_23 = arith.constant 0 : i32
    %42 = vector.broadcast %c0_i32_23 : i32 to vector<32x128xi32>
    %43 = arith.cmpi slt, %39, %42 : vector<32x128xi32>
    %c0_i32_24 = arith.constant 0 : i32
    %44 = arith.cmpi slt, %37, %c0_i32_24 : i32
    %45 = vector.broadcast %44 : i1 to vector<32x128xi1>
    %46 = vector.broadcast %45 : vector<32x128xi1> to vector<32x128xi1>
    %47 = arith.xori %43, %46 : vector<32x128xi1>
    %48 = arith.andi %47, %41 : vector<32x128xi1>
    %49 = vector.broadcast %37 : i32 to vector<32x128xi32>
    %50 = arith.addi %39, %49 : vector<32x128xi32>
    %51 = arith.select %48, %50, %39 : vector<32x128xi1>, vector<32x128xi32>
    %c0_i32_25 = arith.constant 0 : i32
    %52 = vector.broadcast %c0_i32_25 : i32 to vector<32x128xi32>
    %53 = arith.cmpi ne, %51, %52 : vector<32x128xi32>
    %cst_26 = arith.constant 0.000000e+00 : f32
    %54 = vector.broadcast %cst_26 : f32 to vector<32x128xf32>
    %55 = arith.select %53, %34, %54 : vector<32x128xi1>, vector<32x128xf32>
    %c16_i32_27 = arith.constant 16 : i32
    %c0_i32_28 = arith.constant 0 : i32
    %56 = arith.cmpi eq, %c16_i32_27, %c0_i32_28 : i32
    %c1_i32_29 = arith.constant 1 : i32
    %57 = arith.select %56, %c1_i32_29, %c16_i32_27 : i32
    %58 = vector.broadcast %57 : i32 to vector<32x128xi32>
    %59 = arith.remsi %0, %58 : vector<32x128xi32>
    %c0_i32_30 = arith.constant 0 : i32
    %60 = vector.broadcast %c0_i32_30 : i32 to vector<32x128xi32>
    %61 = arith.cmpi ne, %59, %60 : vector<32x128xi32>
    %c0_i32_31 = arith.constant 0 : i32
    %62 = vector.broadcast %c0_i32_31 : i32 to vector<32x128xi32>
    %63 = arith.cmpi slt, %59, %62 : vector<32x128xi32>
    %c0_i32_32 = arith.constant 0 : i32
    %64 = arith.cmpi slt, %57, %c0_i32_32 : i32
    %65 = vector.broadcast %64 : i1 to vector<32x128xi1>
    %66 = vector.broadcast %65 : vector<32x128xi1> to vector<32x128xi1>
    %67 = arith.xori %63, %66 : vector<32x128xi1>
    %68 = arith.andi %67, %61 : vector<32x128xi1>
    %69 = vector.broadcast %57 : i32 to vector<32x128xi32>
    %70 = arith.addi %59, %69 : vector<32x128xi32>
    %71 = arith.select %68, %70, %59 : vector<32x128xi1>, vector<32x128xi32>
    %c15_i32 = arith.constant 15 : i32
    %72 = vector.broadcast %c15_i32 : i32 to vector<32x128xi32>
    %73 = arith.cmpi ne, %71, %72 : vector<32x128xi32>
    %cst_33 = arith.constant 0.000000e+00 : f32
    %74 = vector.broadcast %cst_33 : f32 to vector<32x128xf32>
    %75 = arith.select %73, %35, %74 : vector<32x128xi1>, vector<32x128xf32>
    %76 = tpu.concatenate %55, %33, %75 in 1 : vector<32x128xf32>, vector<32x128xf32>, vector<32x128xf32> -> vector<32x384xf32>
    %c0_34 = arith.constant 0 : index
    %c0_35 = arith.constant 0 : index
    %c0_36 = arith.constant 0 : index
    %77 = vector.load %arg3[%c0_34, %c0_35, %c0_36] : memref<6x384x128xbf16, #tpu.memory_space<vmem>>, vector<1x384x128xbf16>
    %78 = vector.shape_cast %77 : vector<1x384x128xbf16> to vector<384x128xbf16>
    %79 = arith.extf %78 : vector<384x128xbf16> to vector<384x128xf32>
    %cst_37 = arith.constant dense<0.000000e+00> : vector<32x128xf32>
    %80 = tpu.matmul %76, %79, %cst_37 {dimension_numbers = #tpu.dot_dimension_numbers<[1], [0], [0], [1], [0, 0, 1, 1], [], []>} : vector<32x384xf32>, vector<384x128xf32>, vector<32x128xf32> -> vector<32x128xf32>
    %c0_38 = arith.constant 0 : index
    %c0_39 = arith.constant 0 : index
    %c0_40 = arith.constant 0 : index
    %81 = vector.load %arg4[%c0_38, %c0_39, %c0_40] : memref<6x1x128xf32, #tpu.memory_space<vmem>>, vector<1x1x128xf32>
    %82 = vector.shape_cast %81 : vector<1x1x128xf32> to vector<1x128xf32>
    %83 = vector.broadcast %82 : vector<1x128xf32> to vector<32x128xf32>
    %84 = arith.addf %80, %83 : vector<32x128xf32>
    %cst_41 = arith.constant 0.000000e+00 : f32
    %85 = vector.broadcast %cst_41 : f32 to vector<32x128xf32>
    %86 = arith.subf %85, %84 : vector<32x128xf32>
    %87 = math.exp %86 : vector<32x128xf32>
    %cst_42 = arith.constant 1.000000e+00 : f32
    %88 = vector.broadcast %cst_42 : f32 to vector<32x128xf32>
    %89 = arith.addf %88, %87 : vector<32x128xf32>
    %90 = tpu.reciprocal %89 : vector<32x128xf32> -> vector<32x128xf32>
    %91 = arith.mulf %84, %90 : vector<32x128xf32>
    %c1_i32_43 = arith.constant 1 : i32
    %92 = tpu.dynamic_rotate %91 by %c1_i32_43 dim 0 : vector<32x128xf32>, i32 -> vector<32x128xf32>
    %c31_i32_44 = arith.constant 31 : i32
    %93 = tpu.dynamic_rotate %91 by %c31_i32_44 dim 0 : vector<32x128xf32>, i32 -> vector<32x128xf32>
    %c16_i32_45 = arith.constant 16 : i32
    %c0_i32_46 = arith.constant 0 : i32
    %94 = arith.cmpi eq, %c16_i32_45, %c0_i32_46 : i32
    %c1_i32_47 = arith.constant 1 : i32
    %95 = arith.select %94, %c1_i32_47, %c16_i32_45 : i32
    %96 = vector.broadcast %95 : i32 to vector<32x128xi32>
    %97 = arith.remsi %0, %96 : vector<32x128xi32>
    %c0_i32_48 = arith.constant 0 : i32
    %98 = vector.broadcast %c0_i32_48 : i32 to vector<32x128xi32>
    %99 = arith.cmpi ne, %97, %98 : vector<32x128xi32>
    %c0_i32_49 = arith.constant 0 : i32
    %100 = vector.broadcast %c0_i32_49 : i32 to vector<32x128xi32>
    %101 = arith.cmpi slt, %97, %100 : vector<32x128xi32>
    %c0_i32_50 = arith.constant 0 : i32
    %102 = arith.cmpi slt, %95, %c0_i32_50 : i32
    %103 = vector.broadcast %102 : i1 to vector<32x128xi1>
    %104 = vector.broadcast %103 : vector<32x128xi1> to vector<32x128xi1>
    %105 = arith.xori %101, %104 : vector<32x128xi1>
    %106 = arith.andi %105, %99 : vector<32x128xi1>
    %107 = vector.broadcast %95 : i32 to vector<32x128xi32>
    %108 = arith.addi %97, %107 : vector<32x128xi32>
    %109 = arith.select %106, %108, %97 : vector<32x128xi1>, vector<32x128xi32>
    %c0_i32_51 = arith.constant 0 : i32
    %110 = vector.broadcast %c0_i32_51 : i32 to vector<32x128xi32>
    %111 = arith.cmpi ne, %109, %110 : vector<32x128xi32>
    %cst_52 = arith.constant 0.000000e+00 : f32
    %112 = vector.broadcast %cst_52 : f32 to vector<32x128xf32>
    %113 = arith.select %111, %92, %112 : vector<32x128xi1>, vector<32x128xf32>
    %c16_i32_53 = arith.constant 16 : i32
    %c0_i32_54 = arith.constant 0 : i32
    %114 = arith.cmpi eq, %c16_i32_53, %c0_i32_54 : i32
    %c1_i32_55 = arith.constant 1 : i32
    %115 = arith.select %114, %c1_i32_55, %c16_i32_53 : i32
    %116 = vector.broadcast %115 : i32 to vector<32x128xi32>
    %117 = arith.remsi %0, %116 : vector<32x128xi32>
    %c0_i32_56 = arith.constant 0 : i32
    %118 = vector.broadcast %c0_i32_56 : i32 to vector<32x128xi32>
    %119 = arith.cmpi ne, %117, %118 : vector<32x128xi32>
    %c0_i32_57 = arith.constant 0 : i32
    %120 = vector.broadcast %c0_i32_57 : i32 to vector<32x128xi32>
    %121 = arith.cmpi slt, %117, %120 : vector<32x128xi32>
    %c0_i32_58 = arith.constant 0 : i32
    %122 = arith.cmpi slt, %115, %c0_i32_58 : i32
    %123 = vector.broadcast %122 : i1 to vector<32x128xi1>
    %124 = vector.broadcast %123 : vector<32x128xi1> to vector<32x128xi1>
    %125 = arith.xori %121, %124 : vector<32x128xi1>
    %126 = arith.andi %125, %119 : vector<32x128xi1>
    %127 = vector.broadcast %115 : i32 to vector<32x128xi32>
    %128 = arith.addi %117, %127 : vector<32x128xi32>
    %129 = arith.select %126, %128, %117 : vector<32x128xi1>, vector<32x128xi32>
    %c15_i32_59 = arith.constant 15 : i32
    %130 = vector.broadcast %c15_i32_59 : i32 to vector<32x128xi32>
    %131 = arith.cmpi ne, %129, %130 : vector<32x128xi32>
    %cst_60 = arith.constant 0.000000e+00 : f32
    %132 = vector.broadcast %cst_60 : f32 to vector<32x128xf32>
    %133 = arith.select %131, %93, %132 : vector<32x128xi1>, vector<32x128xf32>
    %134 = tpu.concatenate %113, %91, %133 in 1 : vector<32x128xf32>, vector<32x128xf32>, vector<32x128xf32> -> vector<32x384xf32>
    %c1_61 = arith.constant 1 : index
    %c0_62 = arith.constant 0 : index
    %c0_63 = arith.constant 0 : index
    %135 = vector.load %arg3[%c1_61, %c0_62, %c0_63] : memref<6x384x128xbf16, #tpu.memory_space<vmem>>, vector<1x384x128xbf16>
    %136 = vector.shape_cast %135 : vector<1x384x128xbf16> to vector<384x128xbf16>
    %137 = arith.extf %136 : vector<384x128xbf16> to vector<384x128xf32>
    %cst_64 = arith.constant dense<0.000000e+00> : vector<32x128xf32>
    %138 = tpu.matmul %134, %137, %cst_64 {dimension_numbers = #tpu.dot_dimension_numbers<[1], [0], [0], [1], [0, 0, 1, 1], [], []>} : vector<32x384xf32>, vector<384x128xf32>, vector<32x128xf32> -> vector<32x128xf32>
    %c1_65 = arith.constant 1 : index
    %c0_66 = arith.constant 0 : index
    %c0_67 = arith.constant 0 : index
    %139 = vector.load %arg4[%c1_65, %c0_66, %c0_67] : memref<6x1x128xf32, #tpu.memory_space<vmem>>, vector<1x1x128xf32>
    %140 = vector.shape_cast %139 : vector<1x1x128xf32> to vector<1x128xf32>
    %141 = vector.broadcast %140 : vector<1x128xf32> to vector<32x128xf32>
    %142 = arith.addf %138, %141 : vector<32x128xf32>
    %cst_68 = arith.constant 0.000000e+00 : f32
    %143 = vector.broadcast %cst_68 : f32 to vector<32x128xf32>
    %144 = arith.subf %143, %142 : vector<32x128xf32>
    %145 = math.exp %144 : vector<32x128xf32>
    %cst_69 = arith.constant 1.000000e+00 : f32
    %146 = vector.broadcast %cst_69 : f32 to vector<32x128xf32>
    %147 = arith.addf %146, %145 : vector<32x128xf32>
    %148 = tpu.reciprocal %147 : vector<32x128xf32> -> vector<32x128xf32>
    %149 = arith.mulf %142, %148 : vector<32x128xf32>
    %c0_70 = arith.constant 0 : index
    %c0_71 = arith.constant 0 : index
    %c0_72 = arith.constant 0 : index
    %c0_73 = arith.constant 0 : index
    %150 = vector.load %arg2[%c0_70, %c0_71, %c0_72, %c0_73] : memref<2x3x32x32xbf16, #tpu.memory_space<vmem>>, vector<1x1x32x32xbf16>
    %151 = vector.shape_cast %150 : vector<1x1x32x32xbf16> to vector<32x32xbf16>
    %152 = arith.extf %151 : vector<32x32xbf16> to vector<32x32xf32>
    %cst_74 = arith.constant dense<0.000000e+00> : vector<32x128xf32>
    %153 = tpu.matmul %152, %149, %cst_74 {dimension_numbers = #tpu.dot_dimension_numbers<[1], [0], [0], [1], [0, 0, 1, 1], [], []>} : vector<32x32xf32>, vector<32x128xf32>, vector<32x128xf32> -> vector<32x128xf32>
    %c0_75 = arith.constant 0 : index
    %c1_76 = arith.constant 1 : index
    %c0_77 = arith.constant 0 : index
    %c0_78 = arith.constant 0 : index
    %154 = vector.load %arg2[%c0_75, %c1_76, %c0_77, %c0_78] : memref<2x3x32x32xbf16, #tpu.memory_space<vmem>>, vector<1x1x32x32xbf16>
    %155 = vector.shape_cast %154 : vector<1x1x32x32xbf16> to vector<32x32xbf16>
    %156 = arith.extf %155 : vector<32x32xbf16> to vector<32x32xf32>
    %cst_79 = arith.constant dense<0.000000e+00> : vector<32x128xf32>
    %157 = tpu.matmul %156, %149, %cst_79 {dimension_numbers = #tpu.dot_dimension_numbers<[1], [0], [0], [1], [0, 0, 1, 1], [], []>} : vector<32x32xf32>, vector<32x128xf32>, vector<32x128xf32> -> vector<32x128xf32>
    %c0_80 = arith.constant 0 : index
    %c2_81 = arith.constant 2 : index
    %c0_82 = arith.constant 0 : index
    %c0_83 = arith.constant 0 : index
    %158 = vector.load %arg2[%c0_80, %c2_81, %c0_82, %c0_83] : memref<2x3x32x32xbf16, #tpu.memory_space<vmem>>, vector<1x1x32x32xbf16>
    %159 = vector.shape_cast %158 : vector<1x1x32x32xbf16> to vector<32x32xbf16>
    %160 = arith.extf %159 : vector<32x32xbf16> to vector<32x32xf32>
    %cst_84 = arith.constant dense<0.000000e+00> : vector<32x128xf32>
    %161 = tpu.matmul %160, %149, %cst_84 {dimension_numbers = #tpu.dot_dimension_numbers<[1], [0], [0], [1], [0, 0, 1, 1], [], []>} : vector<32x32xf32>, vector<32x128xf32>, vector<32x128xf32> -> vector<32x128xf32>
    %162 = tpu.concatenate %153, %157, %161 in 1 : vector<32x128xf32>, vector<32x128xf32>, vector<32x128xf32> -> vector<32x384xf32>
    %c2_85 = arith.constant 2 : index
    %c0_86 = arith.constant 0 : index
    %c0_87 = arith.constant 0 : index
    %163 = vector.load %arg3[%c2_85, %c0_86, %c0_87] : memref<6x384x128xbf16, #tpu.memory_space<vmem>>, vector<1x384x128xbf16>
    %164 = vector.shape_cast %163 : vector<1x384x128xbf16> to vector<384x128xbf16>
    %165 = arith.extf %164 : vector<384x128xbf16> to vector<384x128xf32>
    %cst_88 = arith.constant dense<0.000000e+00> : vector<32x128xf32>
    %166 = tpu.matmul %162, %165, %cst_88 {dimension_numbers = #tpu.dot_dimension_numbers<[1], [0], [0], [1], [0, 0, 1, 1], [], []>} : vector<32x384xf32>, vector<384x128xf32>, vector<32x128xf32> -> vector<32x128xf32>
    %c2_89 = arith.constant 2 : index
    %c0_90 = arith.constant 0 : index
    %c0_91 = arith.constant 0 : index
    %167 = vector.load %arg4[%c2_89, %c0_90, %c0_91] : memref<6x1x128xf32, #tpu.memory_space<vmem>>, vector<1x1x128xf32>
    %168 = vector.shape_cast %167 : vector<1x1x128xf32> to vector<1x128xf32>
    %169 = vector.broadcast %168 : vector<1x128xf32> to vector<32x128xf32>
    %170 = arith.addf %166, %169 : vector<32x128xf32>
    %cst_92 = arith.constant 0.000000e+00 : f32
    %171 = vector.broadcast %cst_92 : f32 to vector<32x128xf32>
    %172 = arith.subf %171, %170 : vector<32x128xf32>
    %173 = math.exp %172 : vector<32x128xf32>
    %cst_93 = arith.constant 1.000000e+00 : f32
    %174 = vector.broadcast %cst_93 : f32 to vector<32x128xf32>
    %175 = arith.addf %174, %173 : vector<32x128xf32>
    %176 = tpu.reciprocal %175 : vector<32x128xf32> -> vector<32x128xf32>
    %177 = arith.mulf %170, %176 : vector<32x128xf32>
    %c16_i32_94 = arith.constant 16 : i32
    %178 = vector.broadcast %c16_i32_94 : i32 to vector<32x128xi32>
    %179 = arith.cmpi slt, %0, %178 : vector<32x128xi32>
    %cst_95 = arith.constant 0.000000e+00 : f32
    %180 = vector.broadcast %cst_95 : f32 to vector<32x128xf32>
    %181 = arith.select %179, %177, %180 : vector<32x128xi1>, vector<32x128xf32>
    %c1_i32_96 = arith.constant 1 : i32
    %182 = tpu.dynamic_rotate %181 by %c1_i32_96 dim 0 : vector<32x128xf32>, i32 -> vector<32x128xf32>
    %c31_i32_97 = arith.constant 31 : i32
    %183 = tpu.dynamic_rotate %181 by %c31_i32_97 dim 0 : vector<32x128xf32>, i32 -> vector<32x128xf32>
    %c8_i32 = arith.constant 8 : i32
    %c0_i32_98 = arith.constant 0 : i32
    %184 = arith.cmpi eq, %c8_i32, %c0_i32_98 : i32
    %c1_i32_99 = arith.constant 1 : i32
    %185 = arith.select %184, %c1_i32_99, %c8_i32 : i32
    %186 = vector.broadcast %185 : i32 to vector<32x128xi32>
    %187 = arith.remsi %0, %186 : vector<32x128xi32>
    %c0_i32_100 = arith.constant 0 : i32
    %188 = vector.broadcast %c0_i32_100 : i32 to vector<32x128xi32>
    %189 = arith.cmpi ne, %187, %188 : vector<32x128xi32>
    %c0_i32_101 = arith.constant 0 : i32
    %190 = vector.broadcast %c0_i32_101 : i32 to vector<32x128xi32>
    %191 = arith.cmpi slt, %187, %190 : vector<32x128xi32>
    %c0_i32_102 = arith.constant 0 : i32
    %192 = arith.cmpi slt, %185, %c0_i32_102 : i32
    %193 = vector.broadcast %192 : i1 to vector<32x128xi1>
    %194 = vector.broadcast %193 : vector<32x128xi1> to vector<32x128xi1>
    %195 = arith.xori %191, %194 : vector<32x128xi1>
    %196 = arith.andi %195, %189 : vector<32x128xi1>
    %197 = vector.broadcast %185 : i32 to vector<32x128xi32>
    %198 = arith.addi %187, %197 : vector<32x128xi32>
    %199 = arith.select %196, %198, %187 : vector<32x128xi1>, vector<32x128xi32>
    %c0_i32_103 = arith.constant 0 : i32
    %200 = vector.broadcast %c0_i32_103 : i32 to vector<32x128xi32>
    %201 = arith.cmpi ne, %199, %200 : vector<32x128xi32>
    %cst_104 = arith.constant 0.000000e+00 : f32
    %202 = vector.broadcast %cst_104 : f32 to vector<32x128xf32>
    %203 = arith.select %201, %182, %202 : vector<32x128xi1>, vector<32x128xf32>
    %c8_i32_105 = arith.constant 8 : i32
    %c0_i32_106 = arith.constant 0 : i32
    %204 = arith.cmpi eq, %c8_i32_105, %c0_i32_106 : i32
    %c1_i32_107 = arith.constant 1 : i32
    %205 = arith.select %204, %c1_i32_107, %c8_i32_105 : i32
    %206 = vector.broadcast %205 : i32 to vector<32x128xi32>
    %207 = arith.remsi %0, %206 : vector<32x128xi32>
    %c0_i32_108 = arith.constant 0 : i32
    %208 = vector.broadcast %c0_i32_108 : i32 to vector<32x128xi32>
    %209 = arith.cmpi ne, %207, %208 : vector<32x128xi32>
    %c0_i32_109 = arith.constant 0 : i32
    %210 = vector.broadcast %c0_i32_109 : i32 to vector<32x128xi32>
    %211 = arith.cmpi slt, %207, %210 : vector<32x128xi32>
    %c0_i32_110 = arith.constant 0 : i32
    %212 = arith.cmpi slt, %205, %c0_i32_110 : i32
    %213 = vector.broadcast %212 : i1 to vector<32x128xi1>
    %214 = vector.broadcast %213 : vector<32x128xi1> to vector<32x128xi1>
    %215 = arith.xori %211, %214 : vector<32x128xi1>
    %216 = arith.andi %215, %209 : vector<32x128xi1>
    %217 = vector.broadcast %205 : i32 to vector<32x128xi32>
    %218 = arith.addi %207, %217 : vector<32x128xi32>
    %219 = arith.select %216, %218, %207 : vector<32x128xi1>, vector<32x128xi32>
    %c7_i32 = arith.constant 7 : i32
    %220 = vector.broadcast %c7_i32 : i32 to vector<32x128xi32>
    %221 = arith.cmpi ne, %219, %220 : vector<32x128xi32>
    %cst_111 = arith.constant 0.000000e+00 : f32
    %222 = vector.broadcast %cst_111 : f32 to vector<32x128xf32>
    %223 = arith.select %221, %183, %222 : vector<32x128xi1>, vector<32x128xf32>
    %224 = tpu.concatenate %203, %181, %223 in 1 : vector<32x128xf32>, vector<32x128xf32>, vector<32x128xf32> -> vector<32x384xf32>
    %c3_112 = arith.constant 3 : index
    %c0_113 = arith.constant 0 : index
    %c0_114 = arith.constant 0 : index
    %225 = vector.load %arg3[%c3_112, %c0_113, %c0_114] : memref<6x384x128xbf16, #tpu.memory_space<vmem>>, vector<1x384x128xbf16>
    %226 = vector.shape_cast %225 : vector<1x384x128xbf16> to vector<384x128xbf16>
    %227 = arith.extf %226 : vector<384x128xbf16> to vector<384x128xf32>
    %cst_115 = arith.constant dense<0.000000e+00> : vector<32x128xf32>
    %228 = tpu.matmul %224, %227, %cst_115 {dimension_numbers = #tpu.dot_dimension_numbers<[1], [0], [0], [1], [0, 0, 1, 1], [], []>} : vector<32x384xf32>, vector<384x128xf32>, vector<32x128xf32> -> vector<32x128xf32>
    %c3_116 = arith.constant 3 : index
    %c0_117 = arith.constant 0 : index
    %c0_118 = arith.constant 0 : index
    %229 = vector.load %arg4[%c3_116, %c0_117, %c0_118] : memref<6x1x128xf32, #tpu.memory_space<vmem>>, vector<1x1x128xf32>
    %230 = vector.shape_cast %229 : vector<1x1x128xf32> to vector<1x128xf32>
    %231 = vector.broadcast %230 : vector<1x128xf32> to vector<32x128xf32>
    %232 = arith.addf %228, %231 : vector<32x128xf32>
    %cst_119 = arith.constant 0.000000e+00 : f32
    %233 = vector.broadcast %cst_119 : f32 to vector<32x128xf32>
    %234 = arith.subf %233, %232 : vector<32x128xf32>
    %235 = math.exp %234 : vector<32x128xf32>
    %cst_120 = arith.constant 1.000000e+00 : f32
    %236 = vector.broadcast %cst_120 : f32 to vector<32x128xf32>
    %237 = arith.addf %236, %235 : vector<32x128xf32>
    %238 = tpu.reciprocal %237 : vector<32x128xf32> -> vector<32x128xf32>
    %239 = arith.mulf %232, %238 : vector<32x128xf32>
    %c16_i32_121 = arith.constant 16 : i32
    %240 = vector.broadcast %c16_i32_121 : i32 to vector<32x128xi32>
    %241 = arith.cmpi slt, %0, %240 : vector<32x128xi32>
    %cst_122 = arith.constant 0.000000e+00 : f32
    %242 = vector.broadcast %cst_122 : f32 to vector<32x128xf32>
    %243 = arith.select %241, %239, %242 : vector<32x128xi1>, vector<32x128xf32>
    %c1_123 = arith.constant 1 : index
    %c0_124 = arith.constant 0 : index
    %c0_125 = arith.constant 0 : index
    %c0_126 = arith.constant 0 : index
    %244 = vector.load %arg2[%c1_123, %c0_124, %c0_125, %c0_126] : memref<2x3x32x32xbf16, #tpu.memory_space<vmem>>, vector<1x1x32x32xbf16>
    %245 = vector.shape_cast %244 : vector<1x1x32x32xbf16> to vector<32x32xbf16>
    %246 = arith.extf %245 : vector<32x32xbf16> to vector<32x32xf32>
    %cst_127 = arith.constant dense<0.000000e+00> : vector<32x128xf32>
    %247 = tpu.matmul %246, %243, %cst_127 {dimension_numbers = #tpu.dot_dimension_numbers<[1], [0], [0], [1], [0, 0, 1, 1], [], []>} : vector<32x32xf32>, vector<32x128xf32>, vector<32x128xf32> -> vector<32x128xf32>
    %c1_128 = arith.constant 1 : index
    %c1_129 = arith.constant 1 : index
    %c0_130 = arith.constant 0 : index
    %c0_131 = arith.constant 0 : index
    %248 = vector.load %arg2[%c1_128, %c1_129, %c0_130, %c0_131] : memref<2x3x32x32xbf16, #tpu.memory_space<vmem>>, vector<1x1x32x32xbf16>
    %249 = vector.shape_cast %248 : vector<1x1x32x32xbf16> to vector<32x32xbf16>
    %250 = arith.extf %249 : vector<32x32xbf16> to vector<32x32xf32>
    %cst_132 = arith.constant dense<0.000000e+00> : vector<32x128xf32>
    %251 = tpu.matmul %250, %243, %cst_132 {dimension_numbers = #tpu.dot_dimension_numbers<[1], [0], [0], [1], [0, 0, 1, 1], [], []>} : vector<32x32xf32>, vector<32x128xf32>, vector<32x128xf32> -> vector<32x128xf32>
    %c1_133 = arith.constant 1 : index
    %c2_134 = arith.constant 2 : index
    %c0_135 = arith.constant 0 : index
    %c0_136 = arith.constant 0 : index
    %252 = vector.load %arg2[%c1_133, %c2_134, %c0_135, %c0_136] : memref<2x3x32x32xbf16, #tpu.memory_space<vmem>>, vector<1x1x32x32xbf16>
    %253 = vector.shape_cast %252 : vector<1x1x32x32xbf16> to vector<32x32xbf16>
    %254 = arith.extf %253 : vector<32x32xbf16> to vector<32x32xf32>
    %cst_137 = arith.constant dense<0.000000e+00> : vector<32x128xf32>
    %255 = tpu.matmul %254, %243, %cst_137 {dimension_numbers = #tpu.dot_dimension_numbers<[1], [0], [0], [1], [0, 0, 1, 1], [], []>} : vector<32x32xf32>, vector<32x128xf32>, vector<32x128xf32> -> vector<32x128xf32>
    %256 = tpu.concatenate %247, %251, %255 in 1 : vector<32x128xf32>, vector<32x128xf32>, vector<32x128xf32> -> vector<32x384xf32>
    %c4 = arith.constant 4 : index
    %c0_138 = arith.constant 0 : index
    %c0_139 = arith.constant 0 : index
    %257 = vector.load %arg3[%c4, %c0_138, %c0_139] : memref<6x384x128xbf16, #tpu.memory_space<vmem>>, vector<1x384x128xbf16>
    %258 = vector.shape_cast %257 : vector<1x384x128xbf16> to vector<384x128xbf16>
    %259 = arith.extf %258 : vector<384x128xbf16> to vector<384x128xf32>
    %cst_140 = arith.constant dense<0.000000e+00> : vector<32x128xf32>
    %260 = tpu.matmul %256, %259, %cst_140 {dimension_numbers = #tpu.dot_dimension_numbers<[1], [0], [0], [1], [0, 0, 1, 1], [], []>} : vector<32x384xf32>, vector<384x128xf32>, vector<32x128xf32> -> vector<32x128xf32>
    %c4_141 = arith.constant 4 : index
    %c0_142 = arith.constant 0 : index
    %c0_143 = arith.constant 0 : index
    %261 = vector.load %arg4[%c4_141, %c0_142, %c0_143] : memref<6x1x128xf32, #tpu.memory_space<vmem>>, vector<1x1x128xf32>
    %262 = vector.shape_cast %261 : vector<1x1x128xf32> to vector<1x128xf32>
    %263 = vector.broadcast %262 : vector<1x128xf32> to vector<32x128xf32>
    %264 = arith.addf %260, %263 : vector<32x128xf32>
    %cst_144 = arith.constant 0.000000e+00 : f32
    %265 = vector.broadcast %cst_144 : f32 to vector<32x128xf32>
    %266 = arith.subf %265, %264 : vector<32x128xf32>
    %267 = math.exp %266 : vector<32x128xf32>
    %cst_145 = arith.constant 1.000000e+00 : f32
    %268 = vector.broadcast %cst_145 : f32 to vector<32x128xf32>
    %269 = arith.addf %268, %267 : vector<32x128xf32>
    %270 = tpu.reciprocal %269 : vector<32x128xf32> -> vector<32x128xf32>
    %271 = arith.mulf %264, %270 : vector<32x128xf32>
    %c8_i32_146 = arith.constant 8 : i32
    %272 = vector.broadcast %c8_i32_146 : i32 to vector<32x128xi32>
    %273 = arith.cmpi slt, %0, %272 : vector<32x128xi32>
    %cst_147 = arith.constant 0.000000e+00 : f32
    %274 = vector.broadcast %cst_147 : f32 to vector<32x128xf32>
    %275 = arith.select %273, %271, %274 : vector<32x128xi1>, vector<32x128xf32>
    %c1_i32_148 = arith.constant 1 : i32
    %276 = tpu.dynamic_rotate %275 by %c1_i32_148 dim 0 : vector<32x128xf32>, i32 -> vector<32x128xf32>
    %c31_i32_149 = arith.constant 31 : i32
    %277 = tpu.dynamic_rotate %275 by %c31_i32_149 dim 0 : vector<32x128xf32>, i32 -> vector<32x128xf32>
    %c4_i32 = arith.constant 4 : i32
    %c0_i32_150 = arith.constant 0 : i32
    %278 = arith.cmpi eq, %c4_i32, %c0_i32_150 : i32
    %c1_i32_151 = arith.constant 1 : i32
    %279 = arith.select %278, %c1_i32_151, %c4_i32 : i32
    %280 = vector.broadcast %279 : i32 to vector<32x128xi32>
    %281 = arith.remsi %0, %280 : vector<32x128xi32>
    %c0_i32_152 = arith.constant 0 : i32
    %282 = vector.broadcast %c0_i32_152 : i32 to vector<32x128xi32>
    %283 = arith.cmpi ne, %281, %282 : vector<32x128xi32>
    %c0_i32_153 = arith.constant 0 : i32
    %284 = vector.broadcast %c0_i32_153 : i32 to vector<32x128xi32>
    %285 = arith.cmpi slt, %281, %284 : vector<32x128xi32>
    %c0_i32_154 = arith.constant 0 : i32
    %286 = arith.cmpi slt, %279, %c0_i32_154 : i32
    %287 = vector.broadcast %286 : i1 to vector<32x128xi1>
    %288 = vector.broadcast %287 : vector<32x128xi1> to vector<32x128xi1>
    %289 = arith.xori %285, %288 : vector<32x128xi1>
    %290 = arith.andi %289, %283 : vector<32x128xi1>
    %291 = vector.broadcast %279 : i32 to vector<32x128xi32>
    %292 = arith.addi %281, %291 : vector<32x128xi32>
    %293 = arith.select %290, %292, %281 : vector<32x128xi1>, vector<32x128xi32>
    %c0_i32_155 = arith.constant 0 : i32
    %294 = vector.broadcast %c0_i32_155 : i32 to vector<32x128xi32>
    %295 = arith.cmpi ne, %293, %294 : vector<32x128xi32>
    %cst_156 = arith.constant 0.000000e+00 : f32
    %296 = vector.broadcast %cst_156 : f32 to vector<32x128xf32>
    %297 = arith.select %295, %276, %296 : vector<32x128xi1>, vector<32x128xf32>
    %c4_i32_157 = arith.constant 4 : i32
    %c0_i32_158 = arith.constant 0 : i32
    %298 = arith.cmpi eq, %c4_i32_157, %c0_i32_158 : i32
    %c1_i32_159 = arith.constant 1 : i32
    %299 = arith.select %298, %c1_i32_159, %c4_i32_157 : i32
    %300 = vector.broadcast %299 : i32 to vector<32x128xi32>
    %301 = arith.remsi %0, %300 : vector<32x128xi32>
    %c0_i32_160 = arith.constant 0 : i32
    %302 = vector.broadcast %c0_i32_160 : i32 to vector<32x128xi32>
    %303 = arith.cmpi ne, %301, %302 : vector<32x128xi32>
    %c0_i32_161 = arith.constant 0 : i32
    %304 = vector.broadcast %c0_i32_161 : i32 to vector<32x128xi32>
    %305 = arith.cmpi slt, %301, %304 : vector<32x128xi32>
    %c0_i32_162 = arith.constant 0 : i32
    %306 = arith.cmpi slt, %299, %c0_i32_162 : i32
    %307 = vector.broadcast %306 : i1 to vector<32x128xi1>
    %308 = vector.broadcast %307 : vector<32x128xi1> to vector<32x128xi1>
    %309 = arith.xori %305, %308 : vector<32x128xi1>
    %310 = arith.andi %309, %303 : vector<32x128xi1>
    %311 = vector.broadcast %299 : i32 to vector<32x128xi32>
    %312 = arith.addi %301, %311 : vector<32x128xi32>
    %313 = arith.select %310, %312, %301 : vector<32x128xi1>, vector<32x128xi32>
    %c3_i32 = arith.constant 3 : i32
    %314 = vector.broadcast %c3_i32 : i32 to vector<32x128xi32>
    %315 = arith.cmpi ne, %313, %314 : vector<32x128xi32>
    %cst_163 = arith.constant 0.000000e+00 : f32
    %316 = vector.broadcast %cst_163 : f32 to vector<32x128xf32>
    %317 = arith.select %315, %277, %316 : vector<32x128xi1>, vector<32x128xf32>
    %318 = tpu.concatenate %297, %275, %317 in 1 : vector<32x128xf32>, vector<32x128xf32>, vector<32x128xf32> -> vector<32x384xf32>
    %c5 = arith.constant 5 : index
    %c0_164 = arith.constant 0 : index
    %c0_165 = arith.constant 0 : index
    %319 = vector.load %arg3[%c5, %c0_164, %c0_165] : memref<6x384x128xbf16, #tpu.memory_space<vmem>>, vector<1x384x128xbf16>
    %320 = vector.shape_cast %319 : vector<1x384x128xbf16> to vector<384x128xbf16>
    %321 = arith.extf %320 : vector<384x128xbf16> to vector<384x128xf32>
    %cst_166 = arith.constant dense<0.000000e+00> : vector<32x128xf32>
    %322 = tpu.matmul %318, %321, %cst_166 {dimension_numbers = #tpu.dot_dimension_numbers<[1], [0], [0], [1], [0, 0, 1, 1], [], []>} : vector<32x384xf32>, vector<384x128xf32>, vector<32x128xf32> -> vector<32x128xf32>
    %c5_167 = arith.constant 5 : index
    %c0_168 = arith.constant 0 : index
    %c0_169 = arith.constant 0 : index
    %323 = vector.load %arg4[%c5_167, %c0_168, %c0_169] : memref<6x1x128xf32, #tpu.memory_space<vmem>>, vector<1x1x128xf32>
    %324 = vector.shape_cast %323 : vector<1x1x128xf32> to vector<1x128xf32>
    %325 = vector.broadcast %324 : vector<1x128xf32> to vector<32x128xf32>
    %326 = arith.addf %322, %325 : vector<32x128xf32>
    %c8_i32_170 = arith.constant 8 : i32
    %327 = vector.broadcast %c8_i32_170 : i32 to vector<32x128xi32>
    %328 = arith.cmpi slt, %0, %327 : vector<32x128xi32>
    %cst_171 = arith.constant 0.000000e+00 : f32
    %329 = vector.broadcast %cst_171 : f32 to vector<32x128xf32>
    %330 = arith.select %328, %326, %329 : vector<32x128xi1>, vector<32x128xf32>
    %331 = vector.extract_strided_slice %330 {offsets = [0, 0], sizes = [8, 128], strides = [1, 1]} : vector<32x128xf32> to vector<8x128xf32>
    %c0_172 = arith.constant 0 : index
    %c0_173 = arith.constant 0 : index
    %332 = vector.load %arg5[%c0_172, %c0_173] : memref<8x128xf32, #tpu.memory_space<vmem>>, vector<8x128xf32>
    tpu.vector_store %arg5[%c0_172, %c0_173], %331 {strides = array<i32>} : memref<8x128xf32, #tpu.memory_space<vmem>>, vector<8x128xf32>,
    return
  }
}

</mosaic_0001>

<bundles_post_ra>
// kernel: conditioning_embedding_pallas.1
= control target key start
LH: loop header
LB: loop body
LE: loop exit
PB: predicated region body
PF: predicated region fallthrough
CT: control target
= control target key end

     0   :  { %10 = vsyncpa [#allocation3], 0  ;;  %s3817_s0 = inlined_call_operand.hbm [shape: f32[128,16], index: 0, kind: input, shape index: {}]   ;;  %s3818_s1 = inlined_call_operand.hbm [shape: bf16[4,16,128], index: 1, kind: input, shape index: {}]   ;;  %s3819_s2 = inlined_call_operand.hbm [shape: bf16[2,3,32,32], index: 2, kind: input, shape index: {}]   ;;  %s3820_s3 = inlined_call_operand.hbm [shape: bf16[6,384,128], index: 3, kind: input, shape index: {}]   ;;  %s3821_s4 = inlined_call_operand.hbm [shape: f32[6,1,128], index: 4, kind: input, shape index: {}]   ;;  %s3822_s5 = inlined_call_operand.vmem [shape: f32[8,128], index: 5, kind: output, shape index: {}]  }
   0x1   :  { %11 = vsyncpa [#allocation5], 0  ;;  %s30_s20 = sshll.u32 %s3818_s1, 4  ;;  %s31_s20 = int_to_ptr.hbm [resolvable:$true] %s30_s20 }
   0x2   :  { %12 = vsyncpa [#allocation8], 0  ;;  %s3453_s21 = smov [#allocation4]   ;;  %s56_s25 = sshll.u32 %s3820_s3, 4  ;;  %s57_s25 = int_to_ptr.hbm [resolvable:$true] %s56_s25 }
   0x3   :  { %s32_s22 = sshll.u32 %s3453_s21, 4  ;;  %s3454_s26 = smov 64   ;;  %s33_s22 = int_to_ptr.vmem [resolvable:$true] %s32_s22 }
   0x4   :  { %s3455_s27 = smov 4   ;;  %s3456_s28 = smov [#allocation7]  }
   0x5   :  { %38 = dma.hbm_to_vmem [thread:$0]  %s31_s20, 512, %s33_s22, [#allocation5], %s3454_s26, %s3454_s26, %s3455_s27  }
   0x6   :  { %s58_s29 = sshll.u32 %s3456_s28, 4  ;;  %s17_s7 = sshll.u32 %s3817_s0, 4  ;;  %s59_s29 = int_to_ptr.vmem [resolvable:$true] %s58_s29  ;;  %s18_s7 = int_to_ptr.hbm [resolvable:$true] %s17_s7 }
   0x7   :  { %64 = dma.hbm_to_vmem [thread:$0]  %s57_s25, 18432, %s59_s29, [#allocation8], %s3454_s26, %s3454_s26, %s3455_s27  }
   0x8   :  { %s3457_s1 = smov [#allocation2]   ;;  %s43_s3 = sshll.u32 %s3819_s2, 4  ;;  %s44_s3 = int_to_ptr.hbm [resolvable:$true] %s43_s3 }
   0x9   :  { %s19_s8 = sshll.u32 %s3457_s1, 4  ;;  %s3458_s11 = smov 128   ;;  %s20_s8 = int_to_ptr.vmem [resolvable:$true] %s19_s8 }
   0xa   :  { %s3459_s12 = smov 8   ;;  %s3460_s13 = smov [#allocation6]  }
   0xb   :  { %25 = dma.hbm_to_vmem [thread:$0]  %s18_s7, 2048, %s20_s8, [#allocation3], %s3458_s11, %s3458_s11, %s3459_s12  }
   0xc   :  { %s45_s14 = sshll.u32 %s3460_s13, 4  ;;  %s69_s0 = sshll.u32 %s3821_s4, 4  ;;  %s46_s14 = int_to_ptr.vmem [resolvable:$true] %s45_s14  ;;  %s70_s0 = int_to_ptr.hbm [resolvable:$true] %s69_s0 }
   0xd   :  { %51 = dma.hbm_to_vmem [thread:$0]  %s44_s3, 1536, %s46_s14, [#allocation5], %s3454_s26, %s3454_s26, %s3455_s27  }
   0xe   :  { %s3461_s17 = smov [#allocation9]   ;;  %s3462_s19 = smov 16  }
   0xf   :  { %s71_s18 = sshll.u32 %s3461_s17, 4  ;;  %s3463_s20 = smov 1   ;;  %s72_s18 = int_to_ptr.vmem [resolvable:$true] %s71_s18 }
  0x10   :  { %77 = dma.hbm_to_vmem [thread:$0]  %s70_s0, 96, %s72_s18, [#allocation8], %s3462_s19, %s3462_s19, %s3463_s20  }
  0x11   :  { %3447 = dma.done.wait [#allocation3], 2048  }
  0x12   :  { %3448 = vsyncadd [#allocation3], 4294965248 }
  0x13   :  { %3449 = dma.done.wait [#allocation5], 2048  }
  0x14   :  { %3450 = vsyncadd [#allocation5], 4294965248 }
  0x15   :  { %3451 = dma.done.wait [#allocation8], 18528  }
  0x16   :  { %3452 = vsyncadd [#allocation8], 4294948768  ;;  %v2482_v0 = vld [vmem:[#allocation4 + $0x10] sm:$0xff]   ;;  %v2486_v1 = vld [vmem:[#allocation4 + $0x18] sm:$0xff]   ;;  %vm120_vm0 = vcmask 130048  }
  0x17   :  { %v2484_v2 = vunpack.c.h.bf16 %v2482_v0  ;;  %v2483_v3 = vunpack.c.l.bf16 %v2482_v0  ;;  %v2488_v4 = vunpack.c.h.bf16 %v2486_v1  ;;  %v2478_v5 = vld [vmem:[#allocation4 + $0x8] sm:$0xff]   ;;  %v2474_v6 = vld [vmem:[#allocation4] sm:$0xff]   ;;  %v2487_v7 = vunpack.c.l.bf16 %v2486_v1  ;;  %v257_v11 = vld [vmem:[#allocation2 + $0x30] sm:$0xff] }
  0x18   :  { %v2480_v8 = vunpack.c.h.bf16 %v2478_v5  ;;  %v2476_v9 = vunpack.c.h.bf16 %v2474_v6  ;;  %v203_v10 = vld [vmem:[#allocation2 + $0x20] sm:$0xff]  ;;  %v2479_v12 = vunpack.c.l.bf16 %v2478_v5  ;;  %v2475_v13 = vunpack.c.l.bf16 %v2474_v6  ;;  %v111_v14 = vld [vmem:[#allocation2 + $0x10] sm:$0xff]  ;;  %v3127_v16 = vld [vmem:[#allocation7 + $0x78] sm:$0xff]  }
  0x19   :  { %238 = vmatpush.msra.mxu2 %v2484_v2  ;;  %292 = vmatpush.msra.mxu3 %v2488_v4  ;;  %v103_v15 = vld [vmem:[#allocation2] sm:$0xff]  ;;  %v2552_v17 = vunpack.c.h.bf16 %v3127_v16  ;;  %v2551_v18 = vunpack.c.l.bf16 %v3127_v16  ;;  %v3126_v19 = vld [vmem:[#allocation7 + $0x70] sm:$0xff]   ;;  %v3135_v20 = vld [vmem:[#allocation7 + $0xb8] sm:$0xff]  }
  0x1a   :  { %147 = vmatpush.msra.mxu0 %v2480_v8  ;;  %188 = vmatpush.msra.mxu1 %v2476_v9  ;;  %v3134_v21 = vld [vmem:[#allocation7 + $0xb0] sm:$0xff]   ;;  %v204_v22 = vld [vmem:[#allocation2 + $0x28] sm:$0xff]  ;;  %v258_v23 = vld [vmem:[#allocation2 + $0x38] sm:$0xff]  ;;  %v2548_v24 = vunpack.c.h.bf16 %v3126_v19  ;;  %v2584_v26 = vunpack.c.h.bf16 %v3135_v20  ;;  %v2583_v27 = vunpack.c.l.bf16 %v3135_v20  ;;  %v2547_v28 = vunpack.c.l.bf16 %v3126_v19 }
  0x1b   :  { %239 = vmatpush.msra.mxu2 %v2483_v3  ;;  %293 = vmatpush.msra.mxu3 %v2487_v7  ;;  %v3125_v25 = vld [vmem:[#allocation7 + $0x68] sm:$0xff]   ;;  %v2580_v29 = vunpack.c.h.bf16 %v3134_v21  ;;  %v112_v31 = vld [vmem:[#allocation2 + $0x18] sm:$0xff]  ;;  %v2579_v34 = vunpack.c.l.bf16 %v3134_v21  ;;  %v3124_v35 = vld [vmem:[#allocation7 + $0x60] sm:$0xff]  }
  0x1c   :  { %2417 = vmatmul.msk.f32.vlgmr.msra.gmra.mxu2 %vm120_vm0, %v203_v10  ;;  %2421 = vmatmul.msk.f32.vlgmr.msra.gmra.mxu3 %vm120_vm0, %v257_v11  ;;  %v3133_v30 = vld [vmem:[#allocation7 + $0xa8] sm:$0xff]   ;;  %v2544_v33 = vunpack.c.h.bf16 %v3125_v25  ;;  %v2543_v36 = vunpack.c.l.bf16 %v3125_v25  ;;  %v3132_v38 = vld [vmem:[#allocation7 + $0xa0] sm:$0xff]   ;;  %v2540_v39 = vunpack.c.h.bf16 %v3124_v35  ;;  %v3123_v41 = vld [vmem:[#allocation7 + $0x58] sm:$0xff]   ;;  %v2539_v44 = vunpack.c.l.bf16 %v3124_v35 }
  0x1d   :  { %148 = vmatpush.msra.mxu0 %v2479_v12  ;;  %189 = vmatpush.msra.mxu1 %v2475_v13  ;;  %v104_v32 = vld [vmem:[#allocation2 + $0x8] sm:$0xff]  ;;  %v2576_v37 = vunpack.c.h.bf16 %v3133_v30  ;;  %v2575_v40 = vunpack.c.l.bf16 %v3133_v30  ;;  %v205_v42 = vld [vmem:[#allocation2 + $0x60] sm:$0xff]  ;;  %v259_v43 = vld [vmem:[#allocation2 + $0x70] sm:$0xff]  ;;  %v2572_v45 = vunpack.c.h.bf16 %v3132_v38  ;;  %v2536_v48 = vunpack.c.h.bf16 %v3123_v41 }
  0x1e   :  { %2409 = vmatmul.msk.f32.vlgmr.msra.gmra.mxu0 %vm120_vm0, %v111_v14  ;;  %2413 = vmatmul.msk.f32.vlgmr.msra.gmra.mxu1 %vm120_vm0, %v103_v15  ;;  %v113_v46 = vld [vmem:[#allocation2 + $0x50] sm:$0xff]  ;;  %v105_v47 = vld [vmem:[#allocation2 + $0x40] sm:$0xff]  ;;  %v2535_v50 = vunpack.c.l.bf16 %v3123_v41  ;;  %v206_v52 = vld [vmem:[#allocation2 + $0x68] sm:$0xff]  ;;  %v2571_v59 = vunpack.c.l.bf16 %v3132_v38 }
  0x1f   :  { %522 = vmatpush.msrb.mxu1 %v2552_v17  ;;  %551 = vmatpush.msrb.mxu2 %v2584_v26  ;;  %v3122_v49 = vld [vmem:[#allocation7 + $0x50] sm:$0xff]   ;;  %v260_v53 = vld [vmem:[#allocation2 + $0x78] sm:$0xff]  ;;  %v106_v56 = vld [vmem:[#allocation2 + $0x48] sm:$0xff] }
  0x20   :  { %v2532_v51 = vunpack.c.h.bf16 %v3122_v49  ;;  %v2531_v54 = vunpack.c.l.bf16 %v3122_v49  ;;  %v114_v55 = vld [vmem:[#allocation2 + $0x58] sm:$0xff]  ;;  %v3121_v57 = vld [vmem:[#allocation7 + $0x48] sm:$0xff]   ;;  %v3120_v1 = vld [vmem:[#allocation7 + $0x40] sm:$0xff]  }
  0x21   :  { %523 = vmatpush.msrb.mxu1 %v2551_v18  ;;  %552 = vmatpush.msrb.mxu2 %v2583_v27  ;;  %v2528_v58 = vunpack.c.h.bf16 %v3121_v57  ;;  %v2527_v60 = vunpack.c.l.bf16 %v3121_v57  ;;  %v3119_v61 = vld [vmem:[#allocation7 + $0x38] sm:$0xff]   ;;  %v2524_v2 = vunpack.c.h.bf16 %v3120_v1  ;;  %v2523_v5 = vunpack.c.l.bf16 %v3120_v1  ;;  %v3118_v6 = vld [vmem:[#allocation7 + $0x30] sm:$0xff]   ;;  %v3117_v12 = vld [vmem:[#allocation7 + $0x28] sm:$0xff]  }
  0x22   :  { %v3131_v62 = vld [vmem:[#allocation7 + $0x98] sm:$0xff]   ;;  %v2520_v63 = vunpack.c.h.bf16 %v3119_v61  ;;  %v2519_v3 = vunpack.c.l.bf16 %v3119_v61  ;;  %v3130_v7 = vld [vmem:[#allocation7 + $0x90] sm:$0xff]   ;;  %v2516_v8 = vunpack.c.h.bf16 %v3118_v6  ;;  %v2515_v10 = vunpack.c.l.bf16 %v3118_v6  ;;  %v3129_v13 = vld [vmem:[#allocation7 + $0x88] sm:$0xff]  }
  0x23   :  { %524 = vmatpush.msrb.mxu1 %v2548_v24  ;;  %553 = vmatpush.msrb.mxu2 %v2580_v29  ;;  %v2568_v0 = vunpack.c.h.bf16 %v3131_v62  ;;  %v2567_v4 = vunpack.c.l.bf16 %v3131_v62  ;;  %v2564_v9 = vunpack.c.h.bf16 %v3130_v7  ;;  %v2563_v11 = vunpack.c.l.bf16 %v3130_v7  ;;  %v3116_v18 = vld [vmem:[#allocation7 + $0x20] sm:$0xff]   ;;  %v3115_v24 = vld [vmem:[#allocation7 + $0x18] sm:$0xff]   ;;  %v3114_v27 = vld [vmem:[#allocation7 + $0x10] sm:$0xff]  }
  0x24   :  { %2418 = vmatmul.msk.f32.gmra.mxu2 %vm120_vm0, %v204_v22  ;;  %2422 = vmatmul.msk.f32.gmra.mxu3 %vm120_vm0, %v258_v23  ;;  %v2512_v14 = vunpack.c.h.bf16 %v3117_v12  ;;  %v2560_v15 = vunpack.c.h.bf16 %v3129_v13  ;;  %v2511_v16 = vunpack.c.l.bf16 %v3117_v12  ;;  %v2559_v17 = vunpack.c.l.bf16 %v3129_v13  ;;  %v3128_v19 = vld [vmem:[#allocation7 + $0x80] sm:$0xff]   ;;  %v3113_v30 = vld [vmem:[#allocation7 + $0x8] sm:$0xff]  }
  0x25   :  { %525 = vmatpush.msrb.mxu1 %v2547_v28  ;;  %554 = vmatpush.msrb.mxu2 %v2579_v34  ;;  %v2508_v20 = vunpack.c.h.bf16 %v3116_v18  ;;  %v2556_v21 = vunpack.c.h.bf16 %v3128_v19  ;;  %v2507_v22 = vunpack.c.l.bf16 %v3116_v18  ;;  %v2555_v23 = vunpack.c.l.bf16 %v3128_v19 }
  0x26   :  { %2410 = vmatmul.msk.f32.gmra.mxu0 %vm120_vm0, %v112_v31  ;;  %2414 = vmatmul.msk.f32.gmra.mxu1 %vm120_vm0, %v104_v32  ;;  %v2504_v25 = vunpack.c.h.bf16 %v3115_v24  ;;  %v2503_v26 = vunpack.c.l.bf16 %v3115_v24  ;;  %v2500_v28 = vunpack.c.h.bf16 %v3114_v27  ;;  %v2499_v29 = vunpack.c.l.bf16 %v3114_v27 }
  0x27   :  { %526 = vmatpush.msrb.mxu1 %v2544_v33  ;;  %555 = vmatpush.msrb.mxu2 %v2576_v37  ;;  %v2496_v31 = vunpack.c.h.bf16 %v3113_v30  ;;  %v2495_v32 = vunpack.c.l.bf16 %v3113_v30  ;;  %v2490_v33 = vld [vmem:[#allocation7] sm:$0xff]  }
  0x28   :  { %493 = vmatpush.msrb.mxu0 %v2520_v63  ;;  %v2492_v34 = vunpack.c.h.bf16 %v2490_v33  ;;  %v2491_v38 = vunpack.c.l.bf16 %v2490_v33 }
  0x29   :  { %527 = vmatpush.msrb.mxu1 %v2543_v36  ;;  %556 = vmatpush.msrb.mxu2 %v2575_v40 }
  0x2a   :  { %494 = vmatpush.msrb.mxu0 %v2519_v3 }
  0x2b   :  { %528 = vmatpush.msrb.mxu1 %v2540_v39  ;;  %557 = vmatpush.msrb.mxu2 %v2572_v45  ;;  %v98_v45 = vlaneseq }
  0x2c   :  { %2419 = vmatmul.msk.f32.gmra.mxu2 %vm120_vm0, %v205_v42  ;;  %2423 = vmatmul.msk.f32.gmra.mxu3 %vm120_vm0, %v259_v43 }
  0x2d   :  { %529 = vmatpush.msrb.mxu1 %v2539_v44  ;;  %558 = vmatpush.msrb.mxu2 %v2571_v59  ;;  %v3526_v49 = vshrl.u32 %v98_v45, 7 }
  0x2e   :  { %2411 = vmatmul.msk.f32.gmra.mxu0 %vm120_vm0, %v113_v46  ;;  %2415 = vmatmul.msk.f32.gmra.mxu1 %vm120_vm0, %v105_v47 }
  0x2f   :  { %530 = vmatpush.msrb.mxu1 %v2536_v48  ;;  %559 = vmatpush.msrb.mxu2 %v2568_v0  ;;  %vm324_vm1 = vcmp.lt.s32.totalorder %v3526_v49, 7  ;;  %v3530_v57 = vadd.s32 8, %v3526_v49  ;;  %vm315_vm4 = vcmp.lt.s32.totalorder %v3526_v49, 1 }
  0x30   :  { %495 = vmatpush.msrb.mxu0 %v2516_v8  ;;  %v333_v8 = vand.u32 15, %v3526_v49 }
  0x31   :  { %531 = vmatpush.msrb.mxu1 %v2535_v50  ;;  %560 = vmatpush.msrb.mxu2 %v2567_v4  ;;  %v340_v62 = vand.u32 15, %v3530_v57 }
  0x32   :  { %496 = vmatpush.msrb.mxu0 %v2515_v10  ;;  %vm3544_vm3 = vcmp.ne.s32.totalorder %v333_v8, 0 }
  0x33   :  { %532 = vmatpush.msrb.mxu1 %v2532_v51  ;;  %561 = vmatpush.msrb.mxu2 %v2564_v9  ;;  %vm3535_vm2 = vcmp.ne.s32.totalorder %v340_v62, 15  ;;  %v3144_v62 = vld [vmem:[#allocation7 + $0x108] sm:$0xff]  }
  0x34   :  { %2420 = vmatmul.msk.f32.gmra.mxu2 %vm120_vm0, %v206_v52  ;;  %2424 = vmatmul.msk.f32.gmra.mxu3 %vm120_vm0, %v260_v53 }
  0x35   :  { %533 = vmatpush.msrb.mxu1 %v2531_v54  ;;  %562 = vmatpush.msrb.mxu2 %v2563_v11 }
  0x36   :  { %2412 = vmatmul.msk.f32.gmra.mxu0 %vm120_vm0, %v114_v55  ;;  %2416 = vmatmul.msk.f32.gmra.mxu1 %vm120_vm0, %v106_v56 }
  0x37   :  { %534 = vmatpush.msrb.mxu1 %v2528_v58  ;;  %497 = vmatpush.msrb.mxu0 %v2512_v14 }
  0x38   :  { %563 = vmatpush.msrb.mxu2 %v2560_v15  ;;  %v3549_v15 = vadd.s32 24, %v3526_v49 }
  0x39   :  { %535 = vmatpush.msrb.mxu1 %v2527_v60  ;;  %498 = vmatpush.msrb.mxu0 %v2511_v16 }
  0x3a   :  { %564 = vmatpush.msrb.mxu2 %v2559_v17  ;;  %v354_v18 = vand.u32 15, %v3549_v15 }
  0x3b   :  { %536 = vmatpush.msrb.mxu1 %v2524_v2  ;;  %499 = vmatpush.msrb.mxu0 %v2508_v20 }
  0x3c   :  { %565 = vmatpush.msrb.mxu2 %v2556_v21  ;;  %vm3559_vm5 = vcmp.ne.s32.totalorder %v354_v18, 15  ;;  %v3564_v21 = vadd.s32 16, %v3526_v49  ;;  %v3141_v18 = vld [vmem:[#allocation7 + $0xf0] sm:$0xff]  }
  0x3d   :  { %537 = vmatpush.msrb.mxu1 %v2523_v5  ;;  %500 = vmatpush.msrb.mxu0 %v2507_v22 }
  0x3e   :  { %566 = vmatpush.msrb.mxu2 %v2555_v23  ;;  %v347_v24 = vand.u32 15, %v3564_v21 }
  0x3f   :  { %501 = vmatpush.msrb.mxu0 %v2504_v25 }
  0x40   :  { %vm3573_vm6 = vcmp.ne.s32.totalorder %v347_v24, 0 }
  0x41   :  { %502 = vmatpush.msrb.mxu0 %v2503_v26 }
  0x43   :  { %503 = vmatpush.msrb.mxu0 %v2500_v28 }
  0x45   :  { %504 = vmatpush.msrb.mxu0 %v2499_v29  ;;  %v3150_v29 = vld [vmem:[#allocation7 + $0x138] sm:$0xff]  }
  0x46   :  { %v2648_v30 = vunpack.c.h.bf16 %v3150_v29 }
  0x47   :  { %505 = vmatpush.msrb.mxu0 %v2496_v31  ;;  %v2647_v31 = vunpack.c.l.bf16 %v3150_v29 }
  0x49   :  { %506 = vmatpush.msrb.mxu0 %v2495_v32  ;;  %v3149_v32 = vld [vmem:[#allocation7 + $0x130] sm:$0xff]  }
  0x4a   :  { %v2644_v33 = vunpack.c.h.bf16 %v3149_v32 }
  0x4b   :  { %507 = vmatpush.msrb.mxu0 %v2492_v34  ;;  %v2643_v34 = vunpack.c.l.bf16 %v3149_v32  ;;  %v3140_v32 = vld [vmem:[#allocation7 + $0xe8] sm:$0xff]  }
  0x4d   :  { %508 = vmatpush.msrb.mxu0 %v2491_v38  ;;  %v3158_v38 = vld [vmem:[#allocation7 + $0x178] sm:$0xff]  }
  0x4f   :  { %811 = vmatpush.msra.mxu0 %v2648_v30 }
  0x51   :  { %812 = vmatpush.msra.mxu0 %v2647_v31 }
  0x53   :  { %813 = vmatpush.msra.mxu0 %v2644_v33  ;;  %v3152_v33 = vld [vmem:[#allocation7 + $0x148] sm:$0xff]  }
  0x55   :  { %814 = vmatpush.msra.mxu0 %v2643_v34 }
  0x9b   :  { %v150_v35 = vpop.f32.mrf.mxu0  ;;  %v191_v36 = vpop.f32.mrf.mxu1 }
  0x9c   :  { %v192_v37 = vadd.f32 %v191_v36, %v150_v35  ;;  %v3148_v35 = vld [vmem:[#allocation7 + $0x128] sm:$0xff]  }
  0x9d   :  { %v2640_v36 = vunpack.c.h.bf16 %v3148_v35 }
  0x9f   :  { %v241_v39 = vpop.f32.mrf.mxu2  ;;  %v295_v40 = vpop.f32.mrf.mxu3  ;;  %815 = vmatpush.msra.mxu0 %v2640_v36  ;;  %v2608_v36 = vunpack.c.h.bf16 %v3140_v32 }
  0xa0   :  { %v253_v41 = vadd.f32 %v241_v39, %v192_v37  ;;  %v2639_v37 = vunpack.c.l.bf16 %v3148_v35  ;;  %v2680_v39 = vunpack.c.h.bf16 %v3158_v38 }
  0xa2   :  { %v307_v42 = vadd.f32 %v295_v40, %v253_v41  ;;  %v3147_v40 = vld [vmem:[#allocation7 + $0x120] sm:$0xff]   ;;  %816 = vmatpush.msra.mxu0 %v2639_v37  ;;  %840 = vmatpush.msra.mxu1 %v2680_v39  ;;  %v2656_v37 = vunpack.c.h.bf16 %v3152_v33  ;;  %v2607_v39 = vunpack.c.l.bf16 %v3140_v32 }
  0xa3   :  { %v153_v43 = vpop.f32.mrf.mxu0  ;;  %v194_v44 = vpop.f32.mrf.mxu1  ;;  %v2636_v41 = vunpack.c.h.bf16 %v3147_v40 }
  0xa4   :  { %538 = vmatmul.f32.vlgmr.msrb.gmra.mxu1 %v307_v42  ;;  %v195_v46 = vadd.f32 %v194_v44, %v153_v43  ;;  %v320_v55 = vrot.slane %v307_v42, 1  ;;  %v311_v12 = vrot.slane %v307_v42, 7  ;;  %v2679_v42 = vunpack.c.l.bf16 %v3158_v38  ;;  %v3157_v44 = vld [vmem:[#allocation7 + $0x170] sm:$0xff]  }
  0xa5   :  { %817 = vmatpush.msra.mxu0 %v2636_v41  ;;  %v2635_v43 = vunpack.c.l.bf16 %v3147_v40  ;;  %v2676_v45 = vunpack.c.h.bf16 %v3157_v44  ;;  %v2655_v40 = vunpack.c.l.bf16 %v3152_v33  ;;  %v3139_v41 = vld [vmem:[#allocation7 + $0xe0] sm:$0xff]  }
  0xa6   :  { %841 = vmatpush.msra.mxu1 %v2679_v42  ;;  %v3151_v42 = vld [vmem:[#allocation7 + $0x140] sm:$0xff]  }
  0xa7   :  { %v244_v47 = vpop.f32.mrf.mxu2  ;;  %v298_v48 = vpop.f32.mrf.mxu3  ;;  %818 = vmatpush.msra.mxu0 %v2635_v43 }
  0xa8   :  { %v254_v50 = vadd.f32 %v244_v47, %v195_v46  ;;  %v3146_v46 = vld [vmem:[#allocation7 + $0x118] sm:$0xff]   ;;  %842 = vmatpush.msra.mxu1 %v2676_v45  ;;  %v2652_v45 = vunpack.c.h.bf16 %v3151_v42 }
  0xa9   :  { %v2632_v47 = vunpack.c.h.bf16 %v3146_v46 }
  0xaa   :  { %v308_v51 = vadd.f32 %v298_v48, %v254_v50  ;;  %v2675_v48 = vunpack.c.l.bf16 %v3157_v44  ;;  %v2631_v50 = vunpack.c.l.bf16 %v3146_v46  ;;  %v2604_v44 = vunpack.c.h.bf16 %v3139_v41 }
  0xab   :  { %v156_v52 = vpop.f32.mrf.mxu0  ;;  %v197_v53 = vpop.f32.mrf.mxu1  ;;  %819 = vmatpush.msra.mxu0 %v2632_v47  ;;  %v2603_v47 = vunpack.c.l.bf16 %v3139_v41 }
  0xac   :  { %541 = vmatmul.f32.gmra.mxu1 %v308_v51  ;;  %v198_v54 = vadd.f32 %v197_v53, %v156_v52  ;;  %v321_v56 = vrot.slane %v308_v51, 1  ;;  %v312_v19 = vrot.slane %v308_v51, 7  ;;  %v3156_v51 = vld [vmem:[#allocation7 + $0x168] sm:$0xff]   ;;  %v3145_v53 = vld [vmem:[#allocation7 + $0x110] sm:$0xff]  }
  0xad   :  { %843 = vmatpush.msra.mxu1 %v2675_v48  ;;  %v2672_v52 = vunpack.c.h.bf16 %v3156_v51  ;;  %820 = vmatpush.msra.mxu0 %v2631_v50  ;;  %v2651_v48 = vunpack.c.l.bf16 %v3151_v42 }
  0xae   :  { %v327_v58 = vsel %vm324_vm1, %v320_v55, %v321_v56  ;;  %v318_v22 = vsel %vm315_vm4, %v311_v12, %v312_v19 }
  0xaf   :  { %v247_v59 = vpop.f32.mrf.mxu2  ;;  %567 = vmatmul.f32.vlgmr.msrb.gmra.mxu2 %v327_v58  ;;  %v301_v60 = vpop.f32.mrf.mxu3  ;;  %844 = vmatpush.msra.mxu1 %v2672_v52  ;;  %v2627_v58 = vunpack.c.l.bf16 %v3145_v53  ;;  %v3138_v52 = vld [vmem:[#allocation7 + $0xd8] sm:$0xff]  }
  0xb0   :  { %v255_v61 = vadd.f32 %v247_v59, %v198_v54  ;;  %v2628_v54 = vunpack.c.h.bf16 %v3145_v53  ;;  %v3155_v59 = vld [vmem:[#allocation7 + $0x160] sm:$0xff]  }
  0xb2   :  { %v309_v63 = vadd.f32 %v301_v60, %v255_v61  ;;  %821 = vmatpush.msra.mxu0 %v2628_v54  ;;  %v3583_v60 = vld [vmem:[#allocation9] ss:$0 sm:$0xff]  ;;  %v2668_v61 = vunpack.c.h.bf16 %v3155_v59 }
  0xb3   :  { %v159_v0 = vpop.f32.mrf.mxu0  ;;  %v200_v1 = vpop.f32.mrf.mxu1 }
  0xb4   :  { %544 = vmatmul.f32.gmra.mxu1 %v309_v63  ;;  %v201_v2 = vadd.f32 %v200_v1, %v159_v0  ;;  %v322_v3 = vrot.slane %v309_v63, 1  ;;  %v313_v25 = vrot.slane %v309_v63, 7  ;;  %822 = vmatpush.msra.mxu0 %v2627_v58  ;;  %v2624_v0 = vunpack.c.h.bf16 %v3144_v62 }
  0xb5   :  { %v2667_v1 = vunpack.c.l.bf16 %v3155_v59 }
  0xb6   :  { %v326_v5 = vsel %vm324_vm1, %v321_v56, %v322_v3  ;;  %v317_v27 = vsel %vm315_vm4, %v312_v19, %v313_v25  ;;  %823 = vmatpush.msra.mxu0 %v2624_v0  ;;  %v3153_v19 = vld [vmem:[#allocation7 + $0x150] sm:$0xff]  }
  0xb7   :  { %v250_v6 = vpop.f32.mrf.mxu2  ;;  %2427 = vmatmul.msk.f32.gmra.mxu2 %vm3535_vm2, %v326_v5  ;;  %v304_v7 = vpop.f32.mrf.mxu3  ;;  %v3142_v5 = vld [vmem:[#allocation7 + $0xf8] sm:$0xff]   ;;  %v2660_v24 = vunpack.c.h.bf16 %v3153_v19  ;;  %v2659_v29 = vunpack.c.l.bf16 %v3153_v19 }
  0xb8   :  { %v256_v9 = vadd.f32 %v250_v6, %v201_v2  ;;  %v3154_v6 = vld [vmem:[#allocation7 + $0x158] sm:$0xff]   ;;  %v2616_v8 = vunpack.c.h.bf16 %v3142_v5 }
  0xba   :  { %v310_v10 = vadd.f32 %v304_v7, %v256_v9  ;;  %v2664_v9 = vunpack.c.h.bf16 %v3154_v6  ;;  %782 = vmatpush.msrb.mxu3 %v2616_v8 }
  0xbc   :  { %v314_v13 = vrot.slane %v310_v10, 7  ;;  %547 = vmatmul.f32.gmra.mxu1 %v310_v10  ;;  %v323_v14 = vrot.slane %v310_v10, 1  ;;  %v3143_v10 = vld [vmem:[#allocation7 + $0x100] sm:$0xff]  }
  0xbe   :  { %v319_v16 = vsel %vm315_vm4, %v314_v13, %v311_v12  ;;  %v325_v17 = vsel %vm324_vm1, %v322_v3, %v323_v14  ;;  %v328_v23 = vsel %vm324_vm1, %v323_v14, %v320_v55  ;;  %v316_v28 = vsel %vm315_vm4, %v313_v25, %v314_v13 }
  0xbf   :  { %2425 = vmatmul.msk.f32.vlgmr.msrb.gmra.mxu0 %vm3544_vm3, %v319_v16  ;;  %573 = vmatmul.f32.gmra.mxu2 %v325_v17  ;;  %v2671_v55 = vunpack.c.l.bf16 %v3156_v51  ;;  %v2623_v3 = vunpack.c.l.bf16 %v3144_v62  ;;  %v2620_v12 = vunpack.c.h.bf16 %v3143_v10  ;;  %v2615_v14 = vunpack.c.l.bf16 %v3142_v5  ;;  %v3137_v62 = vld [vmem:[#allocation7 + $0xd0] sm:$0xff]  }
  0xc0   :  { %v2663_v16 = vunpack.c.l.bf16 %v3154_v6  ;;  %v2619_v17 = vunpack.c.l.bf16 %v3143_v10  ;;  %v2596_v0 = vunpack.c.h.bf16 %v3137_v62 }
  0xc1   :  { %845 = vmatpush.msra.mxu1 %v2671_v55  ;;  %824 = vmatpush.msra.mxu0 %v2623_v3  ;;  %v2595_v3 = vunpack.c.l.bf16 %v3137_v62 }
  0xc2   :  { %783 = vmatpush.msrb.mxu3 %v2615_v14 }
  0xc3   :  { %846 = vmatpush.msra.mxu1 %v2668_v61  ;;  %825 = vmatpush.msra.mxu0 %v2620_v12  ;;  %v2599_v61 = vunpack.c.l.bf16 %v3138_v52 }
  0xc5   :  { %847 = vmatpush.msra.mxu1 %v2667_v1  ;;  %826 = vmatpush.msra.mxu0 %v2619_v17  ;;  %v2586_v17 = vld [vmem:[#allocation7 + $0xc0] sm:$0xff]  }
  0xc7   :  { %512 = vmatmul.f32.gmra.mxu0 %v318_v22  ;;  %2428 = vmatmul.msk.f32.gmra.mxu2 %vm3559_vm5, %v328_v23  ;;  %v2612_v23 = vunpack.c.h.bf16 %v3141_v18 }
  0xc8   :  { %848 = vmatpush.msra.mxu1 %v2664_v9  ;;  %v3136_v9 = vld [vmem:[#allocation7 + $0xc8] sm:$0xff]  }
  0xc9   :  { %784 = vmatpush.msrb.mxu3 %v2612_v23  ;;  %v2592_v14 = vunpack.c.h.bf16 %v3136_v9 }
  0xca   :  { %849 = vmatpush.msra.mxu1 %v2663_v16  ;;  %v2591_v16 = vunpack.c.l.bf16 %v3136_v9 }
  0xcc   :  { %850 = vmatpush.msra.mxu1 %v2660_v24 }
  0xce   :  { %851 = vmatpush.msra.mxu1 %v2659_v29 }
  0xcf   :  { %2426 = vmatmul.msk.f32.gmra.mxu0 %vm3573_vm6, %v317_v27 }
  0xd0   :  { %852 = vmatpush.msra.mxu1 %v2656_v37 }
  0xd2   :  { %853 = vmatpush.msra.mxu1 %v2655_v40 }
  0xd4   :  { %854 = vmatpush.msra.mxu1 %v2652_v45 }
  0xd6   :  { %855 = vmatpush.msra.mxu1 %v2651_v48 }
  0xd7   :  { %518 = vmatmul.f32.gmra.mxu0 %v316_v28  ;;  %v2611_v28 = vunpack.c.l.bf16 %v3141_v18 }
  0xd9   :  { %785 = vmatpush.msrb.mxu3 %v2611_v28 }
  0xdb   :  { %786 = vmatpush.msrb.mxu3 %v2608_v36 }
  0xdd   :  { %787 = vmatpush.msrb.mxu3 %v2607_v39 }
  0xdf   :  { %788 = vmatpush.msrb.mxu3 %v2604_v44 }
  0xe1   :  { %789 = vmatpush.msrb.mxu3 %v2603_v47 }
 0x121   :  { %v539_v56 = vpop.f32.mrf.mxu1 }
 0x129   :  { %v542_v25 = vpop.f32.mrf.mxu1 }
 0x131   :  { %v545_v50 = vpop.f32.mrf.mxu1 }
 0x132   :  { %v568_v63 = vpop.f32.mrf.mxu2 }
 0x139   :  { %v548_v12 = vpop.f32.mrf.mxu1 }
 0x13a   :  { %v571_v30 = vpop.f32.mrf.mxu2 }
 0x13c   :  { %v510_v2 = vpop.f32.mrf.mxu0 }
 0x13d   :  { %v511_v7 = vadd.f32 %v3583_v60, %v510_v2 }
 0x13f   :  { %v540_v13 = vadd.f32 %v539_v56, %v511_v7  ;;  %v2600_v56 = vunpack.c.h.bf16 %v3138_v52 }
 0x141   :  { %v3586_v22 = vadd.f32 %v568_v63, %v540_v13  ;;  %790 = vmatpush.msrb.mxu3 %v2600_v56 }
 0x142   :  { %v574_v59 = vpop.f32.mrf.mxu2 }
 0x143   :  { %v580_v27 = vsub.f32 0.0, %v3586_v22  ;;  %791 = vmatpush.msrb.mxu3 %v2599_v61 }
 0x144   :  { %v513_v31 = vpop.f32.mrf.mxu0 }
 0x145   :  { %v584_v34 = vmul.f32 1.442695, %v580_v27  ;;  %v514_v35 = vadd.f32 %v3583_v60, %v513_v31  ;;  %792 = vmatpush.msrb.mxu3 %v2596_v0  ;;  %v2588_v27 = vunpack.c.h.bf16 %v2586_v17  ;;  %v2587_v31 = vunpack.c.l.bf16 %v2586_v17 }
 0x147   :  { %3275 = vpow2.f32 %v584_v34  ;;  %v543_v38 = vadd.f32 %v542_v25, %v514_v35  ;;  %793 = vmatpush.msrb.mxu3 %v2595_v3 }
 0x149   :  { %v3590_v43 = vadd.f32 %v571_v30, %v543_v38  ;;  %794 = vmatpush.msrb.mxu3 %v2592_v14 }
 0x14a   :  { %v577_v23 = vpop.f32.mrf.mxu2 }
 0x14b   :  { %v581_v46 = vsub.f32 0.0, %v3590_v43  ;;  %795 = vmatpush.msrb.mxu3 %v2591_v16 }
 0x14c   :  { %v516_v51 = vpop.f32.mrf.mxu0 }
 0x14d   :  { %v3276_v53 = vpop.eup %3275  ;;  %v586_v54 = vmul.f32 1.442695, %v581_v46  ;;  %v517_v55 = vadd.f32 %v3583_v60, %v516_v51  ;;  %796 = vmatpush.msrb.mxu3 %v2588_v27 }
 0x14e   :  { %v592_v58 = vadd.f32 1.0, %v3276_v53 }
 0x14f   :  { %3277 = vpow2.f32 %v586_v54  ;;  %v546_v63 = vadd.f32 %v545_v50, %v517_v55  ;;  %797 = vmatpush.msrb.mxu3 %v2587_v31 }
 0x150   :  { %3279 = vrcp.f32 %v592_v58  ;;  %v605_v28 = vand.u32 2147483647, %v592_v58  ;;  %vm601_vm8 = vweird.f32 %v592_v58 }
 0x151   :  { %v3594_v1 = vadd.f32 %v574_v59, %v546_v63 }
 0x152   :  { %vm606_vm10 = vcmp.eq.f32.partialorder %v605_v28, 8.507059e+37 }
 0x153   :  { %v582_v2 = vsub.f32 0.0, %v3594_v1 }
 0x154   :  { %v519_v5 = vpop.f32.mrf.mxu0 }
 0x155   :  { %v3278_v6 = vpop.eup %3277  ;;  %v588_v7 = vmul.f32 1.442695, %v582_v2  ;;  %v520_v8 = vadd.f32 %v3583_v60, %v519_v5  ;;  %v607_v60 = vand.u32 2147483648, %v592_v58 }
 0x156   :  { %v3280_v10 = vpop.eup %3279  ;;  %v593_v13 = vadd.f32 1.0, %v3278_v6 }
 0x157   :  { %v597_v18 = vmul.f32 %v3280_v10, %v592_v58  ;;  %3281 = vpow2.f32 %v588_v7  ;;  %v549_v19 = vadd.f32 %v548_v12, %v520_v8  ;;  %vm602_vm7 = vweird.f32 %v3280_v10 }
 0x158   :  { %3283 = vrcp.f32 %v593_v13  ;;  %vm603_vm9 = vmor %vm601_vm8, %vm602_vm7  ;;  %v608_v36 = vor.u32 1.1754944e-38, %v607_v60  ;;  %v621_v44 = vand.u32 2147483648, %v593_v13  ;;  %v619_v46 = vand.u32 2147483647, %v593_v13 }
 0x159   :  { %v598_v24 = vsub.f32 1.0, %v597_v18  ;;  %v3598_v25 = vadd.f32 %v577_v23, %v549_v19  ;;  %vm615_vm12 = vweird.f32 %v593_v13 }
 0x15a   :  { %v622_v52 = vor.u32 1.1754944e-38, %v621_v44  ;;  %vm620_vm14 = vcmp.eq.f32.partialorder %v619_v46, 8.507059e+37 }
 0x15b   :  { %v599_v29 = vmul.f32 %v3280_v10, %v598_v24  ;;  %v583_v30 = vsub.f32 0.0, %v3598_v25 }
 0x15d   :  { %v3282_v32 = vpop.eup %3281  ;;  %v600_v33 = vadd.f32 %v3280_v10, %v599_v29  ;;  %v590_v34 = vmul.f32 1.442695, %v583_v30 }
 0x15e   :  { %v3284_v35 = vpop.eup %3283  ;;  %v594_v37 = vadd.f32 1.0, %v3282_v32 }
 0x15f   :  { %v604_v38 = vsel %vm603_vm9, %v3280_v10, %v600_v33  ;;  %3285 = vpow2.f32 %v590_v34  ;;  %v611_v39 = vmul.f32 %v3284_v35, %v593_v13  ;;  %vm616_vm11 = vweird.f32 %v3284_v35  ;;  %v3270_v34 = vld [vmem:[#allocation9 + $0x1] ss:$0 sm:$0xff] }
 0x160   :  { %v609_v40 = vsel %vm606_vm10, %v608_v36, %v604_v38  ;;  %3287 = vrcp.f32 %v594_v37  ;;  %vm617_vm13 = vmor %vm615_vm12, %vm616_vm11  ;;  %v633_v58 = vand.u32 2147483647, %v594_v37  ;;  %v635_v59 = vand.u32 2147483648, %v594_v37 }
 0x161   :  { %v3602_v41 = vmul.f32 %v609_v40, %v3586_v22  ;;  %v612_v42 = vsub.f32 1.0, %v611_v39  ;;  %vm629_vm0 = vweird.f32 %v594_v37 }
 0x162   :  { %v636_v5 = vor.u32 1.1754944e-38, %v635_v59  ;;  %vm634_vm8 = vcmp.eq.f32.partialorder %v633_v58, 8.507059e+37 }
 0x163   :  { %827 = vmatmul.f32.vlgmr.msra.gmra.mxu0 %v3602_v41  ;;  %v613_v45 = vmul.f32 %v3284_v35, %v612_v42  ;;  %v664_v61 = vrot.slane %v3602_v41, 1  ;;  %v656_v24 = vrot.slane %v3602_v41, 7 }
 0x165   :  { %v3286_v47 = vpop.eup %3285  ;;  %v614_v48 = vadd.f32 %v3284_v35, %v613_v45 }
 0x166   :  { %v3288_v50 = vpop.eup %3287  ;;  %v595_v51 = vadd.f32 1.0, %v3286_v47 }
 0x167   :  { %v618_v53 = vsel %vm617_vm13, %v3284_v35, %v614_v48  ;;  %v625_v54 = vmul.f32 %v3288_v50, %v594_v37  ;;  %vm630_vm15 = vweird.f32 %v3288_v50 }
 0x168   :  { %3289 = vrcp.f32 %v595_v51  ;;  %v623_v22 = vsel %vm620_vm14, %v622_v52, %v618_v53  ;;  %vm631_vm7 = vmor %vm629_vm0, %vm630_vm15  ;;  %v649_v10 = vand.u32 2147483648, %v595_v51  ;;  %v647_v14 = vand.u32 2147483647, %v595_v51 }
 0x169   :  { %v653_v55 = vmul.f32 %v623_v22, %v3590_v43  ;;  %v626_v56 = vsub.f32 1.0, %v625_v54  ;;  %vm643_vm10 = vweird.f32 %v595_v51 }
 0x16a   :  { %v650_v18 = vor.u32 1.1754944e-38, %v649_v10  ;;  %vm648_vm12 = vcmp.eq.f32.partialorder %v647_v14, 8.507059e+37 }
 0x16b   :  { %830 = vmatmul.f32.gmra.mxu0 %v653_v55  ;;  %v665_v62 = vrot.slane %v653_v55, 1  ;;  %v627_v63 = vmul.f32 %v3288_v50, %v626_v56  ;;  %v657_v4 = vrot.slane %v653_v55, 7 }
 0x16d   :  { %v670_v0 = vsel %vm324_vm1, %v664_v61, %v665_v62  ;;  %v628_v2 = vadd.f32 %v3288_v50, %v627_v63  ;;  %v662_v30 = vsel %vm315_vm4, %v656_v24, %v657_v4 }
 0x16e   :  { %v3290_v3 = vpop.eup %3289  ;;  %856 = vmatmul.f32.vlgmr.msra.gmra.mxu1 %v670_v0 }
 0x16f   :  { %v632_v6 = vsel %vm631_vm7, %v3288_v50, %v628_v2  ;;  %v639_v43 = vmul.f32 %v3290_v3, %v595_v51  ;;  %vm644_vm9 = vweird.f32 %v3290_v3 }
 0x170   :  { %v637_v7 = vsel %vm634_vm8, %v636_v5, %v632_v6  ;;  %vm645_vm11 = vmor %vm643_vm10, %vm644_vm9 }
 0x171   :  { %v654_v8 = vmul.f32 %v637_v7, %v3594_v1  ;;  %v640_v9 = vsub.f32 1.0, %v639_v43 }
 0x173   :  { %833 = vmatmul.f32.gmra.mxu0 %v654_v8  ;;  %v666_v12 = vrot.slane %v654_v8, 1  ;;  %v641_v13 = vmul.f32 %v3290_v3, %v640_v9  ;;  %v658_v31 = vrot.slane %v654_v8, 7 }
 0x175   :  { %v669_v16 = vsel %vm324_vm1, %v665_v62, %v666_v12  ;;  %v642_v17 = vadd.f32 %v3290_v3, %v641_v13  ;;  %v661_v32 = vsel %vm315_vm4, %v657_v4, %v658_v31 }
 0x176   :  { %2431 = vmatmul.msk.f32.gmra.mxu1 %vm3535_vm2, %v669_v16 }
 0x177   :  { %v646_v19 = vsel %vm645_vm11, %v3290_v3, %v642_v17 }
 0x178   :  { %v651_v1 = vsel %vm648_vm12, %v650_v18, %v646_v19 }
 0x179   :  { %v655_v23 = vmul.f32 %v651_v1, %v3598_v25 }
 0x17b   :  { %836 = vmatmul.f32.gmra.mxu0 %v655_v23  ;;  %v659_v27 = vrot.slane %v655_v23, 7  ;;  %v667_v28 = vrot.slane %v655_v23, 1 }
 0x17d   :  { %v663_v60 = vsel %vm315_vm4, %v659_v27, %v656_v24  ;;  %v668_v29 = vsel %vm324_vm1, %v666_v12, %v667_v28  ;;  %v671_v25 = vsel %vm324_vm1, %v667_v28, %v664_v61  ;;  %v660_v11 = vsel %vm315_vm4, %v658_v31, %v659_v27  ;;  %v3168_v24 = vld [vmem:[#allocation7 + $0x1b8] sm:$0xff]  }
 0x17e   :  { %2429 = vmatmul.msk.f32.vlgmr.msrb.gmra.mxu3 %vm3544_vm3, %v663_v60  ;;  %862 = vmatmul.f32.gmra.mxu1 %v668_v29  ;;  %v2736_v28 = vunpack.c.h.bf16 %v3168_v24  ;;  %v3167_v60 = vld [vmem:[#allocation7 + $0x1b0] sm:$0xff]   ;;  %v2735_v4 = vunpack.c.l.bf16 %v3168_v24  ;;  %v3184_v24 = vld [vmem:[#allocation7 + $0x238] sm:$0xff]  }
 0x180   :  { %1197 = vmatpush.msrb.mxu1 %v2736_v28  ;;  %v3163_v28 = vld [vmem:[#allocation7 + $0x190] sm:$0xff]  }
 0x182   :  { %1198 = vmatpush.msrb.mxu1 %v2735_v4 }
 0x186   :  { %801 = vmatmul.f32.gmra.mxu3 %v662_v30  ;;  %2432 = vmatmul.msk.f32.gmra.mxu1 %vm3559_vm5, %v671_v25  ;;  %v2732_v25 = vunpack.c.h.bf16 %v3167_v60 }
 0x188   :  { %1199 = vmatpush.msrb.mxu1 %v2732_v25  ;;  %v3183_v25 = vld [vmem:[#allocation7 + $0x230] sm:$0xff]  }
 0x18e   :  { %2430 = vmatmul.msk.f32.gmra.mxu3 %vm3573_vm6, %v661_v32 }
 0x196   :  { %807 = vmatmul.f32.gmra.mxu3 %v660_v11 }
 0x1e0   :  { %v828_v33 = vpop.f32.mrf.mxu0 }
 0x1e8   :  { %v831_v39 = vpop.f32.mrf.mxu0 }
 0x1eb   :  { %v857_v35 = vpop.f32.mrf.mxu1 }
 0x1f0   :  { %v834_v47 = vpop.f32.mrf.mxu0 }
 0x1f3   :  { %v860_v20 = vpop.f32.mrf.mxu1 }
 0x1f8   :  { %v837_v62 = vpop.f32.mrf.mxu0 }
 0x1fb   :  { %v863_v53 = vpop.f32.mrf.mxu1 }
 0x201   :  { %v799_v36 = vpop.f32.mrf.mxu3 }
 0x202   :  { %v800_v37 = vadd.f32 %v3270_v34, %v799_v36 }
 0x203   :  { %v866_v2 = vpop.f32.mrf.mxu1 }
 0x204   :  { %v829_v38 = vadd.f32 %v828_v33, %v800_v37  ;;  %v3166_v33 = vld [vmem:[#allocation7 + $0x1a8] sm:$0xff]  }
 0x206   :  { %v3634_v40 = vadd.f32 %v857_v35, %v829_v38  ;;  %v2731_v35 = vunpack.c.l.bf16 %v3167_v60 }
 0x208   :  { %v869_v26 = vsub.f32 0.0, %v3634_v40  ;;  %1200 = vmatpush.msrb.mxu1 %v2731_v35  ;;  %v2796_v35 = vunpack.c.h.bf16 %v3183_v25 }
 0x209   :  { %v802_v41 = vpop.f32.mrf.mxu3 }
 0x20a   :  { %v803_v42 = vadd.f32 %v3270_v34, %v802_v41  ;;  %v873_v48 = vmul.f32 1.442695, %v869_v26  ;;  %v2728_v41 = vunpack.c.h.bf16 %v3166_v33 }
 0x20c   :  { %v832_v44 = vadd.f32 %v831_v39, %v803_v42  ;;  %3291 = vpow2.f32 %v873_v48  ;;  %1201 = vmatpush.msrb.mxu1 %v2728_v41 }
 0x20e   :  { %v3637_v45 = vadd.f32 %v860_v20, %v832_v44 }
 0x210   :  { %v870_v46 = vsub.f32 0.0, %v3637_v45 }
 0x211   :  { %v805_v50 = vpop.f32.mrf.mxu3 }
 0x212   :  { %v875_v51 = vmul.f32 1.442695, %v870_v46  ;;  %v806_v52 = vadd.f32 %v3270_v34, %v805_v50  ;;  %v3292_v61 = vpop.eup %3291  ;;  %v3165_v46 = vld [vmem:[#allocation7 + $0x1a0] sm:$0xff]  }
 0x213   :  { %v3643_v3 = vadd.f32 1.0, %v3292_v61  ;;  %v2724_v61 = vunpack.c.h.bf16 %v3165_v46 }
 0x214   :  { %v835_v54 = vadd.f32 %v834_v47, %v806_v52  ;;  %3293 = vpow2.f32 %v875_v51  ;;  %v2727_v51 = vunpack.c.l.bf16 %v3166_v33  ;;  %v3718_v33 = vld [vmem:[#allocation7 + $0x188] sm:$0xff]  }
 0x215   :  { %vm890_vm2 = vweird.f32 %v3643_v3  ;;  %v894_v11 = vand.u32 2147483647, %v3643_v3 }
 0x216   :  { %v3640_v22 = vadd.f32 %v863_v53, %v835_v54  ;;  %1202 = vmatpush.msrb.mxu1 %v2727_v51  ;;  %v3160_v54 = vld [vmem:[#allocation6 + $0x18] sm:$0xff]  }
 0x218   :  { %v871_v55 = vsub.f32 0.0, %v3640_v22  ;;  %1203 = vmatpush.msrb.mxu1 %v2724_v61  ;;  %v2695_v61 = vunpack.c.l.bf16 %v3160_v54 }
 0x219   :  { %v808_v56 = vpop.f32.mrf.mxu3 }
 0x21a   :  { %v877_v58 = vmul.f32 1.442695, %v871_v55  ;;  %v809_v59 = vadd.f32 %v3270_v34, %v808_v56  ;;  %v3294_v63 = vpop.eup %3293 }
 0x21b   :  { %v3647_v6 = vadd.f32 1.0, %v3294_v63 }
 0x21c   :  { %3295 = vpow2.f32 %v877_v58  ;;  %v838_v0 = vadd.f32 %v837_v62, %v809_v59  ;;  %v896_v59 = vand.u32 2147483648, %v3643_v3 }
 0x21d   :  { %3297 = vrcp.f32 %v3643_v3  ;;  %vm904_vm0 = vweird.f32 %v3647_v6  ;;  %v908_v48 = vand.u32 2147483647, %v3647_v6  ;;  %v910_v50 = vand.u32 2147483648, %v3647_v6 }
 0x21e   :  { %v3645_v5 = vadd.f32 %v866_v2, %v838_v0  ;;  %3299 = vrcp.f32 %v3647_v6  ;;  %v3164_v0 = vld [vmem:[#allocation7 + $0x198] sm:$0xff]  }
 0x220   :  { %v872_v43 = vsub.f32 0.0, %v3645_v5 }
 0x222   :  { %v3296_v7 = vpop.eup %3295  ;;  %v879_v8 = vmul.f32 1.442695, %v872_v43  ;;  %v911_v43 = vor.u32 1.1754944e-38, %v910_v50  ;;  %v3181_v50 = vld [vmem:[#allocation7 + $0x220] sm:$0xff]  }
 0x223   :  { %v3652_v9 = vadd.f32 1.0, %v3296_v7  ;;  %v3655_v10 = vpop.eup %3297  ;;  %v3179_v7 = vld [vmem:[#allocation7 + $0x210] sm:$0xff]  }
 0x224   :  { %3301 = vpow2.f32 %v879_v8  ;;  %v3657_v12 = vpop.eup %3299  ;;  %v886_v19 = vmul.f32 %v3655_v10, %v3643_v3  ;;  %vm891_vm5 = vweird.f32 %v3655_v10  ;;  %v2723_v8 = vunpack.c.l.bf16 %v3165_v46  ;;  %v3173_v46 = vld [vmem:[#allocation7 + $0x1e0] sm:$0xff]  }
 0x225   :  { %3303 = vrcp.f32 %v3652_v9  ;;  %v900_v18 = vmul.f32 %v3657_v12, %v3647_v6  ;;  %vm905_vm3 = vweird.f32 %v3657_v12  ;;  %vm918_vm6 = vweird.f32 %v3652_v9  ;;  %vm3706_vm12 = vmor %vm890_vm2, %vm891_vm5 }
 0x226   :  { %v887_v27 = vsub.f32 1.0, %v886_v19  ;;  %v922_v39 = vand.u32 2147483647, %v3652_v9  ;;  %v924_v20 = vand.u32 2147483648, %v3652_v9  ;;  %vm3692_vm8 = vmor %vm904_vm0, %vm905_vm3  ;;  %vm909_vm3 = vcmp.eq.f32.partialorder %v908_v48, 8.507059e+37  ;;  %v2682_v19 = vld [vmem:[#allocation6] sm:$0xff]   ;;  %1204 = vmatpush.msrb.mxu1 %v2723_v8 }
 0x227   :  { %v901_v23 = vsub.f32 1.0, %v900_v18  ;;  %vm895_vm2 = vcmp.eq.f32.partialorder %v894_v11, 8.507059e+37  ;;  %vm953_vm5 = vcmask 261120   ;;  %v2683_v60 = vunpack.c.l.bf16 %v2682_v19 }
 0x228   :  { %v888_v34 = vmul.f32 %v3655_v10, %v887_v27  ;;  %v925_v58 = vor.u32 1.1754944e-38, %v924_v20  ;;  %vm923_vm11 = vcmp.eq.f32.partialorder %v922_v39, 8.507059e+37  ;;  %v2799_v11 = vunpack.c.l.bf16 %v3184_v24 }
 0x229   :  { %v902_v32 = vmul.f32 %v3657_v12, %v901_v23  ;;  %v3176_v23 = vld [vmem:[#allocation7 + $0x1f8] sm:$0xff]   ;;  %v2684_v20 = vunpack.c.h.bf16 %v2682_v19  ;;  %v2756_v51 = vunpack.c.h.bf16 %v3173_v46  ;;  %v2779_v19 = vunpack.c.l.bf16 %v3179_v7 }
 0x22a   :  { %v3302_v13 = vpop.eup %3301  ;;  %v889_v55 = vadd.f32 %v3655_v10, %v888_v34  ;;  %v2768_v4 = vunpack.c.h.bf16 %v3176_v23 }
 0x22b   :  { %v3659_v14 = vpop.eup %3303  ;;  %v884_v16 = vadd.f32 1.0, %v3302_v13  ;;  %v903_v26 = vadd.f32 %v3657_v12, %v902_v32  ;;  %v2767_v32 = vunpack.c.l.bf16 %v3176_v23 }
 0x22c   :  { %v914_v17 = vmul.f32 %v3659_v14, %v3652_v9  ;;  %vm919_vm13 = vweird.f32 %v3659_v14 }
 0x22d   :  { %3305 = vrcp.f32 %v884_v16  ;;  %v938_v38 = vand.u32 2147483648, %v884_v16  ;;  %v936_v44 = vand.u32 2147483647, %v884_v16  ;;  %vm3680_vm15 = vmor %vm918_vm6, %vm919_vm13  ;;  %vm932_vm7 = vweird.f32 %v884_v16 }
 0x22e   :  { %v915_v1 = vsub.f32 1.0, %v914_v17  ;;  %v907_v63 = vsel %vm3692_vm8, %v3657_v12, %v903_v26  ;;  %v893_v12 = vsel %vm3706_vm12, %v3655_v10, %v889_v55  ;;  %v2690_v17 = vld [vmem:[#allocation6 + $0x10] sm:$0xff]   ;;  %v2795_v26 = vunpack.c.l.bf16 %v3183_v25  ;;  %v3172_v55 = vld [vmem:[#allocation7 + $0x1d8] sm:$0xff]  }
 0x22f   :  { %v939_v56 = vor.u32 1.1754944e-38, %v938_v38  ;;  %vm937_vm10 = vcmp.eq.f32.partialorder %v936_v44, 8.507059e+37  ;;  %v912_v13 = vsel %vm909_vm3, %v911_v43, %v907_v63  ;;  %v2691_v27 = vunpack.c.l.bf16 %v2690_v17 }
 0x230   :  { %v916_v29 = vmul.f32 %v3659_v14, %v915_v1  ;;  %v2698_v1 = vld [vmem:[#allocation6 + $0x20] sm:$0xff]   ;;  %v942_v10 = vmul.f32 %v912_v13, %v3637_v45  ;;  %v3175_v45 = vld [vmem:[#allocation7 + $0x1f0] sm:$0xff]   ;;  %v2692_v38 = vunpack.c.h.bf16 %v2690_v17  ;;  %v2752_v63 = vunpack.c.h.bf16 %v3172_v55  ;;  %v3178_v17 = vld [vmem:[#allocation7 + $0x208] sm:$0xff]  }
 0x231   :  { %v2764_v34 = vunpack.c.h.bf16 %v3175_v45  ;;  %v2763_v39 = vunpack.c.l.bf16 %v3175_v45  ;;  %v2700_v41 = vunpack.c.h.bf16 %v2698_v1 }
 0x232   :  { %v917_v37 = vadd.f32 %v3659_v14, %v916_v29  ;;  %v2699_v29 = vunpack.c.l.bf16 %v2698_v1  ;;  %v3169_v1 = vld [vmem:[#allocation7 + $0x1c0] sm:$0xff]  }
 0x233   :  { %v3306_v30 = vpop.eup %3305  ;;  %v2740_v23 = vunpack.c.h.bf16 %v3169_v1 }
 0x234   :  { %v928_v31 = vmul.f32 %v3306_v30, %v884_v16  ;;  %vm933_vm14 = vweird.f32 %v3306_v30  ;;  %v921_v53 = vsel %vm3680_vm15, %v3659_v14, %v917_v37  ;;  %v897_v14 = vor.u32 1.1754944e-38, %v896_v59 }
 0x235   :  { %vm934_vm9 = vmor %vm932_vm7, %vm933_vm14  ;;  %v926_v6 = vsel %vm923_vm11, %v925_v58, %v921_v53  ;;  %v2720_v16 = vunpack.c.h.bf16 %v3164_v0  ;;  %v2712_v37 = vunpack.c.h.bf16 %v3718_v33  ;;  %v3159_v53 = vld [vmem:[#allocation6 + $0x8] sm:$0xff]   ;;  %v2788_v58 = vunpack.c.h.bf16 %v3181_v50 }
 0x236   :  { %v929_v36 = vsub.f32 1.0, %v928_v31  ;;  %v943_v3 = vmul.f32 %v926_v6, %v3640_v22  ;;  %v898_v18 = vsel %vm895_vm2, %v897_v14, %v893_v12  ;;  %v2716_v31 = vunpack.c.h.bf16 %v3163_v28  ;;  %v3170_v12 = vld [vmem:[#allocation7 + $0x1c8] sm:$0xff]  }
 0x237   :  { %1205 = vmatpush.msrb.mxu1 %v2720_v16  ;;  %v941_v22 = vmul.f32 %v898_v18, %v3634_v40  ;;  %v2715_v40 = vunpack.c.l.bf16 %v3163_v28  ;;  %v2687_v59 = vunpack.c.l.bf16 %v3159_v53  ;;  %v2751_v6 = vunpack.c.l.bf16 %v3172_v55  ;;  %v3189_v55 = vld [vmem:[#allocation7 + $0x268] sm:$0xff]  }
 0x238   :  { %v930_v42 = vmul.f32 %v3306_v30, %v929_v36  ;;  %v3174_v36 = vld [vmem:[#allocation7 + $0x1e8] sm:$0xff]   ;;  %v2780_v14 = vunpack.c.h.bf16 %v3179_v7  ;;  %v2688_v16 = vunpack.c.h.bf16 %v3159_v53  ;;  %v2744_v18 = vunpack.c.h.bf16 %v3170_v12 }
 0x239   :  { %v2760_v44 = vunpack.c.h.bf16 %v3174_v36  ;;  %v2759_v47 = vunpack.c.l.bf16 %v3174_v36  ;;  %v2711_v28 = vunpack.c.l.bf16 %v3718_v33 }
 0x23a   :  { %v931_v52 = vadd.f32 %v3306_v30, %v930_v42  ;;  %v3182_v42 = vld [vmem:[#allocation7 + $0x228] sm:$0xff]  }
 0x23b   :  { %v2792_v48 = vunpack.c.h.bf16 %v3182_v42 }
 0x23c   :  { %v935_v62 = vsel %vm934_vm9, %v3306_v30, %v931_v52  ;;  %v2800_v30 = vunpack.c.h.bf16 %v3184_v24  ;;  %v2791_v52 = vunpack.c.l.bf16 %v3182_v42  ;;  %v2775_v24 = vunpack.c.l.bf16 %v3178_v17 }
 0x23d   :  { %v940_v2 = vsel %vm937_vm10, %v939_v56, %v935_v62  ;;  %v2755_v56 = vunpack.c.l.bf16 %v3173_v46  ;;  %v3180_v62 = vld [vmem:[#allocation7 + $0x218] sm:$0xff]  }
 0x23e   :  { %v944_v9 = vmul.f32 %v940_v2, %v3645_v5  ;;  %v2719_v5 = vunpack.c.l.bf16 %v3164_v0  ;;  %v2787_v0 = vunpack.c.l.bf16 %v3181_v50  ;;  %v3171_v2 = vld [vmem:[#allocation7 + $0x1d0] sm:$0xff]   ;;  %v2784_v43 = vunpack.c.h.bf16 %v3180_v62 }
 0x23f   :  { %v2748_v8 = vunpack.c.h.bf16 %v3171_v2  ;;  %v2747_v13 = vunpack.c.l.bf16 %v3171_v2 }
 0x240   :  { %978 = vmatpush.msra.mxu2 %v944_v9  ;;  %1028 = vmatpush.msra.mxu3 %v944_v9 }
 0x241   :  { %1078 = vmatpush.msrb.mxu0 %v944_v9  ;;  %1206 = vmatpush.msrb.mxu1 %v2719_v5  ;;  %v2783_v9 = vunpack.c.l.bf16 %v3180_v62  ;;  %v2743_v5 = vunpack.c.l.bf16 %v3170_v12 }
 0x242   :  { %979 = vmatpush.msra.mxu2 %v943_v3  ;;  %1029 = vmatpush.msra.mxu3 %v943_v3 }
 0x243   :  { %1079 = vmatpush.msrb.mxu0 %v943_v3  ;;  %1207 = vmatpush.msrb.mxu1 %v2716_v31  ;;  %v2696_v3 = vunpack.c.h.bf16 %v3160_v54 }
 0x244   :  { %980 = vmatpush.msra.mxu2 %v942_v10  ;;  %1030 = vmatpush.msra.mxu3 %v942_v10 }
 0x245   :  { %1080 = vmatpush.msrb.mxu0 %v942_v10  ;;  %1208 = vmatpush.msrb.mxu1 %v2715_v40  ;;  %v2776_v10 = vunpack.c.h.bf16 %v3178_v17 }
 0x246   :  { %981 = vmatpush.msra.mxu2 %v941_v22  ;;  %1031 = vmatpush.msra.mxu3 %v941_v22 }
 0x247   :  { %1081 = vmatpush.msrb.mxu0 %v941_v22  ;;  %2437 = vmatmul.msk.f32.vlgmr.msra.gmra.mxu3 %vm953_vm5, %v2691_v27  ;;  %v3177_v27 = vld [vmem:[#allocation7 + $0x200] sm:$0xff]   ;;  %v2739_v22 = vunpack.c.l.bf16 %v3169_v1 }
 0x248   :  { %2433 = vmatmul.msk.f32.vlgmr.msra.gmra.mxu2 %vm953_vm5, %v2683_v60  ;;  %2441 = vmatmul.msk.f32.vlgmr.msrb.gmra.mxu0 %vm953_vm5, %v2699_v29  ;;  %v2772_v60 = vunpack.c.h.bf16 %v3177_v27  ;;  %v2706_v29 = vld [vmem:[#allocation7 + $0x180] sm:$0xff]  }
 0x249   :  { %1226 = vmatpush.msrb.mxu2 %v2768_v4  ;;  %1255 = vmatpush.msrb.mxu3 %v2800_v30  ;;  %v2708_v4 = vunpack.c.h.bf16 %v2706_v29  ;;  %v2771_v30 = vunpack.c.l.bf16 %v3177_v27  ;;  %v2707_v45 = vunpack.c.l.bf16 %v2706_v29  ;;  %v3186_v29 = vld [vmem:[#allocation7 + $0x250] sm:$0xff]  }
 0x24a   :  { %1209 = vmatpush.msrb.mxu1 %v2712_v37 }
 0x24b   :  { %1227 = vmatpush.msrb.mxu2 %v2767_v32  ;;  %1256 = vmatpush.msrb.mxu3 %v2799_v11 }
 0x24c   :  { %1210 = vmatpush.msrb.mxu1 %v2711_v28 }
 0x24d   :  { %1228 = vmatpush.msrb.mxu2 %v2764_v34  ;;  %1257 = vmatpush.msrb.mxu3 %v2796_v35 }
 0x24e   :  { %1211 = vmatpush.msrb.mxu1 %v2708_v4  ;;  %v3204_v4 = vld [vmem:[#allocation7 + $0x2e0] sm:$0xff]  }
 0x24f   :  { %2438 = vmatmul.msk.f32.gmra.mxu3 %vm953_vm5, %v2692_v38  ;;  %1229 = vmatpush.msrb.mxu2 %v2763_v39  ;;  %v3199_v38 = vld [vmem:[#allocation7 + $0x2b8] sm:$0xff]  }
 0x250   :  { %2434 = vmatmul.msk.f32.gmra.mxu2 %vm953_vm5, %v2684_v20  ;;  %2442 = vmatmul.msk.f32.gmra.mxu0 %vm953_vm5, %v2700_v41  ;;  %v2864_v39 = vunpack.c.h.bf16 %v3199_v38  ;;  %v2863_v20 = vunpack.c.l.bf16 %v3199_v38  ;;  %v3191_v41 = vld [vmem:[#allocation7 + $0x278] sm:$0xff]  }
 0x251   :  { %1230 = vmatpush.msrb.mxu2 %v2760_v44  ;;  %1258 = vmatpush.msrb.mxu3 %v2795_v26  ;;  %v2832_v42 = vunpack.c.h.bf16 %v3191_v41  ;;  %v3198_v44 = vld [vmem:[#allocation7 + $0x2b0] sm:$0xff]   ;;  %v2831_v46 = vunpack.c.l.bf16 %v3191_v41  ;;  %v3192_v41 = vld [vmem:[#allocation7 + $0x280] sm:$0xff]  }
 0x252   :  { %1212 = vmatpush.msrb.mxu1 %v2707_v45  ;;  %v2860_v26 = vunpack.c.h.bf16 %v3198_v44  ;;  %v2884_v45 = vunpack.c.h.bf16 %v3204_v4 }
 0x253   :  { %1231 = vmatpush.msrb.mxu2 %v2759_v47  ;;  %1259 = vmatpush.msrb.mxu3 %v2792_v48  ;;  %v2859_v47 = vunpack.c.l.bf16 %v3198_v44  ;;  %v3190_v48 = vld [vmem:[#allocation7 + $0x270] sm:$0xff]   ;;  %v2836_v44 = vunpack.c.h.bf16 %v3192_v41 }
 0x254   :  { %1579 = vmatpush.msra.mxu1 %v2864_v39  ;;  %1550 = vmatpush.msra.mxu0 %v2832_v42  ;;  %v2828_v50 = vunpack.c.h.bf16 %v3190_v48  ;;  %v2827_v53 = vunpack.c.l.bf16 %v3190_v48 }
 0x255   :  { %1232 = vmatpush.msrb.mxu2 %v2756_v51  ;;  %1260 = vmatpush.msrb.mxu3 %v2791_v52  ;;  %v3197_v51 = vld [vmem:[#allocation7 + $0x2a8] sm:$0xff]  }
 0x256   :  { %1580 = vmatpush.msra.mxu1 %v2863_v20  ;;  %1551 = vmatpush.msra.mxu0 %v2831_v46  ;;  %v2856_v52 = vunpack.c.h.bf16 %v3197_v51  ;;  %v2855_v54 = vunpack.c.l.bf16 %v3197_v51  ;;  %v2802_v51 = vld [vmem:[#allocation7 + $0x240] sm:$0xff]  }
 0x257   :  { %1233 = vmatpush.msrb.mxu2 %v2755_v56  ;;  %1261 = vmatpush.msrb.mxu3 %v2788_v58  ;;  %v3207_v56 = vld [vmem:[#allocation7 + $0x2f8] sm:$0xff]   ;;  %v2824_v58 = vunpack.c.h.bf16 %v3189_v55 }
 0x258   :  { %2435 = vmatmul.msk.f32.gmra.mxu2 %vm953_vm5, %v2687_v59  ;;  %2439 = vmatmul.msk.f32.gmra.mxu3 %vm953_vm5, %v2695_v61  ;;  %v2896_v59 = vunpack.c.h.bf16 %v3207_v56  ;;  %v3196_v61 = vld [vmem:[#allocation7 + $0x2a0] sm:$0xff]  }
 0x259   :  { %1234 = vmatpush.msrb.mxu2 %v2752_v63  ;;  %1262 = vmatpush.msrb.mxu3 %v2787_v0  ;;  %v2852_v62 = vunpack.c.h.bf16 %v3196_v61  ;;  %v2823_v63 = vunpack.c.l.bf16 %v3189_v55  ;;  %v2895_v0 = vunpack.c.l.bf16 %v3207_v56  ;;  %v2851_v2 = vunpack.c.l.bf16 %v3196_v61 }
 0x25a   :  { %1581 = vmatpush.msra.mxu1 %v2860_v26  ;;  %1552 = vmatpush.msra.mxu0 %v2828_v50  ;;  %v2835_v50 = vunpack.c.l.bf16 %v3192_v41 }
 0x25b   :  { %1235 = vmatpush.msrb.mxu2 %v2751_v6  ;;  %1263 = vmatpush.msrb.mxu3 %v2784_v43  ;;  %v3188_v6 = vld [vmem:[#allocation7 + $0x260] sm:$0xff]   ;;  %v3206_v43 = vld [vmem:[#allocation7 + $0x2f0] sm:$0xff]  }
 0x25c   :  { %1582 = vmatpush.msra.mxu1 %v2859_v47  ;;  %1553 = vmatpush.msra.mxu0 %v2827_v53  ;;  %v2820_v7 = vunpack.c.h.bf16 %v3188_v6  ;;  %v2804_v53 = vunpack.c.h.bf16 %v2802_v51 }
 0x25d   :  { %1236 = vmatpush.msrb.mxu2 %v2748_v8  ;;  %1264 = vmatpush.msrb.mxu3 %v2783_v9  ;;  %v2892_v8 = vunpack.c.h.bf16 %v3206_v43  ;;  %v3195_v9 = vld [vmem:[#allocation7 + $0x298] sm:$0xff]  }
 0x25e   :  { %1583 = vmatpush.msra.mxu1 %v2856_v52  ;;  %1554 = vmatpush.msra.mxu0 %v2824_v58  ;;  %v2848_v12 = vunpack.c.h.bf16 %v3195_v9  ;;  %v2847_v17 = vunpack.c.l.bf16 %v3195_v9  ;;  %v3202_v52 = vld [vmem:[#allocation7 + $0x2d0] sm:$0xff]   ;;  %v2803_v58 = vunpack.c.l.bf16 %v2802_v51 }
 0x25f   :  { %1237 = vmatpush.msrb.mxu2 %v2747_v13  ;;  %1265 = vmatpush.msrb.mxu3 %v2780_v14  ;;  %v2819_v13 = vunpack.c.l.bf16 %v3188_v6  ;;  %v2891_v14 = vunpack.c.l.bf16 %v3206_v43 }
 0x260   :  { %2436 = vmatmul.msk.f32.gmra.mxu2 %vm953_vm5, %v2688_v16  ;;  %2440 = vmatmul.msk.f32.gmra.mxu3 %vm953_vm5, %v2696_v3  ;;  %v3161_v16 = vld [vmem:[#allocation6 + $0x28] sm:$0xff]  }
 0x261   :  { %1238 = vmatpush.msrb.mxu2 %v2744_v18  ;;  %1266 = vmatpush.msrb.mxu3 %v2779_v19  ;;  %v2703_v3 = vunpack.c.l.bf16 %v3161_v16  ;;  %v3187_v18 = vld [vmem:[#allocation7 + $0x258] sm:$0xff]   ;;  %v3205_v19 = vld [vmem:[#allocation7 + $0x2e8] sm:$0xff]  }
 0x262   :  { %1584 = vmatpush.msra.mxu1 %v2855_v54  ;;  %1555 = vmatpush.msra.mxu0 %v2823_v63  ;;  %v2816_v1 = vunpack.c.h.bf16 %v3187_v18  ;;  %v2815_v27 = vunpack.c.l.bf16 %v3187_v18  ;;  %v2887_v28 = vunpack.c.l.bf16 %v3205_v19  ;;  %v2876_v54 = vunpack.c.h.bf16 %v3202_v52 }
 0x263   :  { %1239 = vmatpush.msrb.mxu2 %v2743_v5  ;;  %1267 = vmatpush.msrb.mxu3 %v2776_v10  ;;  %v2888_v5 = vunpack.c.h.bf16 %v3205_v19  ;;  %v3194_v10 = vld [vmem:[#allocation7 + $0x290] sm:$0xff]  }
 0x264   :  { %1585 = vmatpush.msra.mxu1 %v2852_v62  ;;  %1556 = vmatpush.msra.mxu0 %v2820_v7  ;;  %v3201_v62 = vld [vmem:[#allocation7 + $0x2c8] sm:$0xff]  }
 0x265   :  { %1240 = vmatpush.msrb.mxu2 %v2740_v23  ;;  %1268 = vmatpush.msrb.mxu3 %v2775_v24  ;;  %v3271_v23 = vld [vmem:[#allocation9 + $0x2] ss:$0 sm:$0xff]  ;;  %v2844_v24 = vunpack.c.h.bf16 %v3194_v10  ;;  %v2871_v43 = vunpack.c.l.bf16 %v3201_v62 }
 0x266   :  { %1586 = vmatpush.msra.mxu1 %v2851_v2  ;;  %1557 = vmatpush.msra.mxu0 %v2819_v13  ;;  %v2872_v2 = vunpack.c.h.bf16 %v3201_v62 }
 0x267   :  { %1241 = vmatpush.msrb.mxu2 %v2739_v22  ;;  %1269 = vmatpush.msrb.mxu3 %v2772_v60  ;;  %v2843_v60 = vunpack.c.l.bf16 %v3194_v10 }
 0x268   :  { %1587 = vmatpush.msra.mxu1 %v2848_v12  ;;  %2443 = vmatmul.msk.f32.gmra.mxu0 %vm953_vm5, %v2703_v3 }
 0x269   :  { %1270 = vmatpush.msrb.mxu3 %v2771_v30  ;;  %1608 = vmatpush.msra.mxu2 %v2896_v59  ;;  %v2812_v30 = vunpack.c.h.bf16 %v3186_v29  ;;  %v2875_v59 = vunpack.c.l.bf16 %v3202_v52 }
 0x26a   :  { %1588 = vmatpush.msra.mxu1 %v2847_v17  ;;  %1558 = vmatpush.msra.mxu0 %v2816_v1 }
 0x26b   :  { %1609 = vmatpush.msra.mxu2 %v2895_v0 }
 0x26c   :  { %1589 = vmatpush.msra.mxu1 %v2844_v24  ;;  %1559 = vmatpush.msra.mxu0 %v2815_v27 }
 0x26d   :  { %1610 = vmatpush.msra.mxu2 %v2892_v8  ;;  %v3200_v8 = vld [vmem:[#allocation7 + $0x2c0] sm:$0xff]  }
 0x26e   :  { %1590 = vmatpush.msra.mxu1 %v2843_v60  ;;  %1560 = vmatpush.msra.mxu0 %v2812_v30  ;;  %v2868_v12 = vunpack.c.h.bf16 %v3200_v8 }
 0x26f   :  { %1611 = vmatpush.msra.mxu2 %v2891_v14  ;;  %v2867_v14 = vunpack.c.l.bf16 %v3200_v8 }
 0x271   :  { %1612 = vmatpush.msra.mxu2 %v2888_v5 }
 0x273   :  { %1613 = vmatpush.msra.mxu2 %v2887_v28 }
 0x275   :  { %1614 = vmatpush.msra.mxu2 %v2884_v45  ;;  %v1388_v45 = vand.u32 7, %v3526_v49 }
 0x277   :  { %vm1432_vm0 = vcmp.ne.s32.totalorder %v1388_v45, 0  ;;  %vm1440_vm12 = vcmp.ne.s32.totalorder %v1388_v45, 7 }
 0x2c5   :  { %v1083_v25 = vpop.f32.mrf.mxu0 }
 0x2c6   :  { %1271 = vmatmul.f32.vlgmr.msrb.gmra.mxu3 %v1083_v25  ;;  %v3193_v25 = vld [vmem:[#allocation7 + $0x288] sm:$0xff]  }
 0x2ca   :  { %v1033_v31 = vpop.f32.mrf.mxu3 }
 0x2cb   :  { %1242 = vmatmul.f32.vlgmr.msrb.gmra.mxu2 %v1033_v31  ;;  %v983_v32 = vpop.f32.mrf.mxu2 }
 0x2cc   :  { %1213 = vmatmul.f32.vlgmr.msrb.gmra.mxu1 %v983_v32  ;;  %v2840_v32 = vunpack.c.h.bf16 %v3193_v25 }
 0x2cd   :  { %v1086_v11 = vpop.f32.mrf.mxu0 }
 0x2ce   :  { %1274 = vmatmul.f32.gmra.mxu3 %v1086_v11  ;;  %1591 = vmatpush.msra.mxu1 %v2840_v32 }
 0x2d2   :  { %v1036_v33 = vpop.f32.mrf.mxu3 }
 0x2d3   :  { %1245 = vmatmul.f32.gmra.mxu2 %v1036_v33  ;;  %v986_v40 = vpop.f32.mrf.mxu2  ;;  %v2811_v33 = vunpack.c.l.bf16 %v3186_v29 }
 0x2d4   :  { %1216 = vmatmul.f32.gmra.mxu1 %v986_v40  ;;  %v2883_v40 = vunpack.c.l.bf16 %v3204_v4 }
 0x2d5   :  { %1561 = vmatpush.msra.mxu0 %v2811_v33 }
 0x2d6   :  { %1615 = vmatpush.msra.mxu2 %v2883_v40  ;;  %v3464_v40 = vmov 0.0  }
 0x2db   :  { %v989_v34 = vpop.f32.mrf.mxu2  ;;  %v1039_v35 = vpop.f32.mrf.mxu3 }
 0x2dc   :  { %1219 = vmatmul.f32.gmra.mxu1 %v989_v34  ;;  %1248 = vmatmul.f32.gmra.mxu2 %v1039_v35  ;;  %v2704_v34 = vunpack.c.h.bf16 %v3161_v16  ;;  %v2839_v35 = vunpack.c.l.bf16 %v3193_v25 }
 0x2de   :  { %2444 = vmatmul.msk.f32.gmra.mxu0 %vm953_vm5, %v2704_v34  ;;  %1592 = vmatpush.msra.mxu1 %v2839_v35  ;;  %v3739_v34 = vrot.slane %v3464_v40, 7 }
 0x2e0   :  { %1593 = vmatpush.msra.mxu1 %v2836_v44 }
 0x2e2   :  { %1594 = vmatpush.msra.mxu1 %v2835_v50 }
 0x2e3   :  { %v992_v36 = vpop.f32.mrf.mxu2  ;;  %v1042_v37 = vpop.f32.mrf.mxu3 }
 0x2e4   :  { %1222 = vmatmul.f32.gmra.mxu1 %v992_v36  ;;  %1251 = vmatmul.f32.gmra.mxu2 %v1042_v37  ;;  %v3185_v36 = vld [vmem:[#allocation7 + $0x248] sm:$0xff]   ;;  %v3203_v37 = vld [vmem:[#allocation7 + $0x2d8] sm:$0xff]  }
 0x2e5   :  { %v2808_v39 = vunpack.c.h.bf16 %v3185_v36  ;;  %v2880_v20 = vunpack.c.h.bf16 %v3203_v37  ;;  %v2807_v26 = vunpack.c.l.bf16 %v3185_v36  ;;  %v2879_v46 = vunpack.c.l.bf16 %v3203_v37 }
 0x2e7   :  { %1562 = vmatpush.msra.mxu0 %v2808_v39  ;;  %1616 = vmatpush.msra.mxu2 %v2880_v20 }
 0x2e9   :  { %1563 = vmatpush.msra.mxu0 %v2807_v26  ;;  %1617 = vmatpush.msra.mxu2 %v2879_v46 }
 0x2eb   :  { %1564 = vmatpush.msra.mxu0 %v2804_v53  ;;  %1618 = vmatpush.msra.mxu2 %v2876_v54  ;;  %v1402_v53 = vand.u32 7, %v3564_v21  ;;  %v3751_v54 = vrot.slane %v3464_v40, 1 }
 0x2ed   :  { %1565 = vmatpush.msra.mxu0 %v2803_v58  ;;  %1619 = vmatpush.msra.mxu2 %v2875_v59  ;;  %vm1434_vm3 = vcmp.ne.s32.totalorder %v1402_v53, 0  ;;  %v1409_v58 = vand.u32 7, %v3549_v15 }
 0x2ef   :  { %1620 = vmatpush.msra.mxu2 %v2872_v2  ;;  %v3272_v2 = vld [vmem:[#allocation9 + $0x3] ss:$0 sm:$0xff] }
 0x2f1   :  { %1621 = vmatpush.msra.mxu2 %v2871_v43 }
 0x2f3   :  { %1622 = vmatpush.msra.mxu2 %v2868_v12 }
 0x2f5   :  { %1623 = vmatpush.msra.mxu2 %v2867_v14 }
 0x349   :  { %v1214_v22 = vpop.f32.mrf.mxu1  ;;  %v1272_v11 = vpop.f32.mrf.mxu3 }
 0x34a   :  { %v1215_v31 = vadd.f32 %v3271_v23, %v1214_v22 }
 0x34e   :  { %v1243_v38 = vpop.f32.mrf.mxu2 }
 0x34f   :  { %v1244_v42 = vadd.f32 %v1243_v38, %v1215_v31 }
 0x351   :  { %v3733_v47 = vadd.f32 %v1272_v11, %v1244_v42  ;;  %v1217_v48 = vpop.f32.mrf.mxu1  ;;  %v1275_v0 = vpop.f32.mrf.mxu3  ;;  %v1395_v42 = vand.u32 7, %v3530_v57 }
 0x352   :  { %v1218_v56 = vadd.f32 %v3271_v23, %v1217_v48 }
 0x353   :  { %v1284_v55 = vsub.f32 0.0, %v3733_v47  ;;  %vm1433_vm11 = vcmp.ne.s32.totalorder %v1395_v42, 0  ;;  %vm1441_vm2 = vcmp.ne.s32.totalorder %v1395_v42, 7 }
 0x355   :  { %v1288_v61 = vmul.f32 1.442695, %v1284_v55 }
 0x356   :  { %v1246_v63 = vpop.f32.mrf.mxu2 }
 0x357   :  { %3307 = vpow2.f32 %v1288_v61  ;;  %v1247_v6 = vadd.f32 %v1246_v63, %v1218_v56  ;;  %v1089_v61 = vpop.f32.mrf.mxu0 }
 0x358   :  { %1277 = vmatmul.f32.gmra.mxu3 %v1089_v61  ;;  %v3225_v61 = vld [vmem:[#allocation7 + $0x378] sm:$0xff]  }
 0x359   :  { %v1276_v7 = vadd.f32 %v1275_v0, %v1247_v6  ;;  %v1220_v9 = vpop.f32.mrf.mxu1 }
 0x35b   :  { %v1285_v13 = vsub.f32 0.0, %v1276_v7 }
 0x35d   :  { %v3308_v16 = vpop.eup %3307  ;;  %v1290_v3 = vmul.f32 1.442695, %v1285_v13 }
 0x35e   :  { %v1296_v17 = vadd.f32 1.0, %v3308_v16 }
 0x35f   :  { %3309 = vpow2.f32 %v1290_v3  ;;  %v1249_v18 = vpop.f32.mrf.mxu2  ;;  %v1092_v62 = vpop.f32.mrf.mxu0 }
 0x360   :  { %3311 = vrcp.f32 %v1296_v17  ;;  %v1311_v28 = vand.u32 2147483648, %v1296_v17  ;;  %v1309_v60 = vand.u32 2147483647, %v1296_v17  ;;  %vm1305_vm13 = vweird.f32 %v1296_v17  ;;  %1280 = vmatmul.f32.gmra.mxu3 %v1092_v62  ;;  %v3216_v62 = vld [vmem:[#allocation7 + $0x330] sm:$0xff]  }
 0x361   :  { %v1223_v19 = vpop.f32.mrf.mxu1 }
 0x362   :  { %v1312_v30 = vor.u32 1.1754944e-38, %v1311_v28  ;;  %vm1310_vm15 = vcmp.eq.f32.partialorder %v1309_v60, 8.507059e+37 }
 0x365   :  { %v3310_v1 = vpop.eup %3309 }
 0x366   :  { %v3312_v5 = vpop.eup %3311  ;;  %v1297_v10 = vadd.f32 1.0, %v3310_v1 }
 0x367   :  { %v1301_v23 = vmul.f32 %v3312_v5, %v1296_v17  ;;  %v1252_v24 = vpop.f32.mrf.mxu2  ;;  %vm1306_vm6 = vweird.f32 %v3312_v5 }
 0x368   :  { %3313 = vrcp.f32 %v1297_v10  ;;  %vm1307_vm14 = vmor %vm1305_vm13, %vm1306_vm6  ;;  %v1325_v35 = vand.u32 2147483648, %v1297_v10  ;;  %v1323_v38 = vand.u32 2147483647, %v1297_v10  ;;  %vm1319_vm8 = vweird.f32 %v1297_v10 }
 0x369   :  { %v1302_v27 = vsub.f32 1.0, %v1301_v23  ;;  %vm1442_vm6 = vcmp.ne.s32.totalorder %v1402_v53, 7  ;;  %vm1443_vm13 = vcmp.ne.s32.totalorder %v1409_v58, 7 }
 0x36a   :  { %v1326_v41 = vor.u32 1.1754944e-38, %v1325_v35  ;;  %vm1324_vm10 = vcmp.eq.f32.partialorder %v1323_v38, 8.507059e+37 }
 0x36b   :  { %v1303_v22 = vmul.f32 %v3312_v5, %v1302_v27 }
 0x36d   :  { %v1304_v29 = vadd.f32 %v3312_v5, %v1303_v22 }
 0x36e   :  { %v3314_v4 = vpop.eup %3313 }
 0x36f   :  { %v1308_v25 = vsel %vm1307_vm14, %v3312_v5, %v1304_v29  ;;  %v1315_v31 = vmul.f32 %v3314_v4, %v1297_v10  ;;  %vm1320_vm7 = vweird.f32 %v3314_v4  ;;  %vm1435_vm14 = vcmp.ne.s32.totalorder %v1409_v58, 0 }
 0x370   :  { %v1313_v32 = vsel %vm1310_vm15, %v1312_v30, %v1308_v25  ;;  %vm1321_vm9 = vmor %vm1319_vm8, %vm1320_vm7 }
 0x371   :  { %v1356_v11 = vmul.f32 %v1313_v32, %v3733_v47  ;;  %v1316_v33 = vsub.f32 1.0, %v1315_v31 }
 0x373   :  { %v1368_v36 = vrot.slane %v1356_v11, 7  ;;  %v1317_v37 = vmul.f32 %v3314_v4, %v1316_v33  ;;  %1595 = vmatmul.f32.vlgmr.msra.gmra.mxu1 %v1356_v11  ;;  %v1376_v47 = vrot.slane %v1356_v11, 1 }
 0x375   :  { %v1318_v39 = vadd.f32 %v3314_v4, %v1317_v37  ;;  %v1375_v20 = vsel %vm315_vm4, %v3739_v34, %v1368_v36  ;;  %v1383_v59 = vsel %vm324_vm1, %v3751_v54, %v1376_v47 }
 0x376   :  { %2445 = vmatmul.msk.f32.vlgmr.msra.gmra.mxu0 %vm1432_vm0, %v1375_v20 }
 0x377   :  { %v1322_v44 = vsel %vm1321_vm9, %v3314_v4, %v1318_v39 }
 0x378   :  { %v1327_v26 = vsel %vm1324_vm10, %v1326_v41, %v1322_v44 }
 0x379   :  { %v1357_v46 = vmul.f32 %v1327_v26, %v1276_v7 }
 0x37b   :  { %v1377_v48 = vrot.slane %v1357_v46, 1  ;;  %1598 = vmatmul.f32.gmra.mxu1 %v1357_v46  ;;  %v1369_v50 = vrot.slane %v1357_v46, 7  ;;  %v2898_v46 = vld [vmem:[#allocation6 + $0x30] sm:$0xff]  }
 0x37c   :  { %v2899_v53 = vunpack.c.l.bf16 %v2898_v46 }
 0x37d   :  { %v1374_v51 = vsel %vm315_vm4, %v1368_v36, %v1369_v50  ;;  %v1382_v52 = vsel %vm324_vm1, %v1376_v47, %v1377_v48  ;;  %v1373_v55 = vsel %vm315_vm4, %v1369_v50, %v3739_v34  ;;  %v1381_v56 = vsel %vm324_vm1, %v1377_v48, %v3751_v54  ;;  %v3767_v50 = vld [vmem:[#allocation6 + $0x40] sm:$0xff]  }
 0x37e   :  { %2446 = vmatmul.msk.f32.gmra.mxu0 %vm1433_vm11, %v1374_v51  ;;  %2449 = vmatmul.msk.f32.vlgmr.msra.gmra.mxu2 %vm1440_vm12, %v1382_v52  ;;  %v3769_v51 = vld [vmem:[#allocation6 + $0x50] sm:$0xff]  }
 0x37f   :  { %v2915_v58 = vunpack.c.l.bf16 %v3769_v51 }
 0x383   :  { %1601 = vmatmul.f32.gmra.mxu1 %v3464_v40 }
 0x386   :  { %2447 = vmatmul.msk.f32.gmra.mxu0 %vm1434_vm3, %v1373_v55  ;;  %2450 = vmatmul.msk.f32.gmra.mxu2 %vm1441_vm2, %v1381_v56  ;;  %v2907_v56 = vunpack.c.l.bf16 %v3767_v50 }
 0x38b   :  { %1604 = vmatmul.f32.gmra.mxu1 %v3464_v40 }
 0x38e   :  { %2451 = vmatmul.msk.f32.gmra.mxu2 %vm1442_vm6, %v3751_v54  ;;  %2448 = vmatmul.msk.f32.gmra.mxu0 %vm1435_vm14, %v3739_v34 }
 0x396   :  { %2452 = vmatmul.msk.f32.gmra.mxu2 %vm1443_vm13, %v1383_v59  ;;  %v3217_v59 = vld [vmem:[#allocation7 + $0x338] sm:$0xff]  }
 0x3f0   :  { %v1596_v63 = vpop.f32.mrf.mxu1 }
 0x3f3   :  { %v1567_v0 = vpop.f32.mrf.mxu0 }
 0x3f4   :  { %v1568_v7 = vadd.f32 %v3272_v2, %v1567_v0  ;;  %v2951_v0 = vunpack.c.l.bf16 %v3217_v59 }
 0x3f6   :  { %v1597_v8 = vadd.f32 %v1596_v63, %v1568_v7  ;;  %v2952_v63 = vunpack.c.h.bf16 %v3217_v59  ;;  %v3233_v7 = vld [vmem:[#allocation7 + $0x3b8] sm:$0xff]   ;;  %v3209_v59 = vld [vmem:[#allocation6 + $0x48] sm:$0xff]  }
 0x3f8   :  { %v1599_v6 = vpop.f32.mrf.mxu1  ;;  %1969 = vmatpush.msrb.mxu2 %v2952_v63  ;;  %v2911_v63 = vunpack.c.l.bf16 %v3209_v59 }
 0x3fa   :  { %1970 = vmatpush.msrb.mxu2 %v2951_v0 }
 0x3fb   :  { %v1570_v43 = vpop.f32.mrf.mxu0 }
 0x3fc   :  { %v1571_v16 = vadd.f32 %v3272_v2, %v1570_v43  ;;  %v2984_v2 = vunpack.c.h.bf16 %v3225_v61  ;;  %v2983_v43 = vunpack.c.l.bf16 %v3225_v61  ;;  %v3219_v61 = vld [vmem:[#allocation7 + $0x348] sm:$0xff]  }
 0x3fe   :  { %v1600_v18 = vadd.f32 %v1599_v6, %v1571_v16  ;;  %v3224_v6 = vld [vmem:[#allocation7 + $0x370] sm:$0xff]   ;;  %v2900_v16 = vunpack.c.h.bf16 %v2898_v46 }
 0x400   :  { %v1602_v9 = vpop.f32.mrf.mxu1 }
 0x401   :  { %v1625_v12 = vpop.f32.mrf.mxu2  ;;  %v2980_v9 = vunpack.c.h.bf16 %v3224_v6 }
 0x402   :  { %v1626_v13 = vadd.f32 %v1625_v12, %v1597_v8  ;;  %v2948_v8 = vunpack.c.h.bf16 %v3216_v62  ;;  %v3016_v12 = vunpack.c.h.bf16 %v3233_v7 }
 0x403   :  { %v1573_v14 = vpop.f32.mrf.mxu0 }
 0x404   :  { %v1637_v3 = vsub.f32 0.0, %v1626_v13  ;;  %v3215_v14 = vld [vmem:[#allocation7 + $0x328] sm:$0xff]   ;;  %1971 = vmatpush.msrb.mxu2 %v2948_v8  ;;  %v2959_v8 = vunpack.c.l.bf16 %v3219_v61 }
 0x406   :  { %v1641_v17 = vmul.f32 1.442695, %v1637_v3  ;;  %v3223_v3 = vld [vmem:[#allocation7 + $0x368] sm:$0xff]  }
 0x408   :  { %3315 = vpow2.f32 %v1641_v17  ;;  %v1605_v19 = vpop.f32.mrf.mxu1  ;;  %v3015_v17 = vunpack.c.l.bf16 %v3233_v7 }
 0x409   :  { %v1628_v1 = vpop.f32.mrf.mxu2  ;;  %v2979_v19 = vunpack.c.l.bf16 %v3224_v6  ;;  %v3229_v6 = vld [vmem:[#allocation7 + $0x398] sm:$0xff]  }
 0x40a   :  { %v1629_v5 = vadd.f32 %v1628_v1, %v1600_v18  ;;  %v2947_v18 = vunpack.c.l.bf16 %v3216_v62  ;;  %v3000_v7 = vunpack.c.h.bf16 %v3229_v6 }
 0x40c   :  { %v1638_v10 = vsub.f32 0.0, %v1629_v5  ;;  %1972 = vmatpush.msrb.mxu2 %v2947_v18 }
 0x40e   :  { %v3316_v23 = vpop.eup %3315  ;;  %v1643_v24 = vmul.f32 1.442695, %v1638_v10  ;;  %v2976_v10 = vunpack.c.h.bf16 %v3223_v3 }
 0x40f   :  { %v1649_v27 = vadd.f32 1.0, %v3316_v23  ;;  %v3214_v23 = vld [vmem:[#allocation7 + $0x320] sm:$0xff]  }
 0x410   :  { %3317 = vpow2.f32 %v1643_v24  ;;  %v3222_v24 = vld [vmem:[#allocation7 + $0x360] sm:$0xff]  }
 0x411   :  { %3319 = vrcp.f32 %v1649_v27  ;;  %v1631_v28 = vpop.f32.mrf.mxu2  ;;  %vm1658_vm0 = vweird.f32 %v1649_v27  ;;  %v1664_v35 = vand.u32 2147483648, %v1649_v27  ;;  %v1662_v37 = vand.u32 2147483647, %v1649_v27 }
 0x412   :  { %v2943_v28 = vunpack.c.l.bf16 %v3215_v14 }
 0x413   :  { %v1665_v42 = vor.u32 1.1754944e-38, %v1664_v35  ;;  %vm1663_vm11 = vcmp.eq.f32.partialorder %v1662_v37, 8.507059e+37  ;;  %v2971_v35 = vunpack.c.l.bf16 %v3222_v24 }
 0x416   :  { %v3318_v22 = vpop.eup %3317 }
 0x417   :  { %v3320_v60 = vpop.eup %3319  ;;  %v1650_v29 = vadd.f32 1.0, %v3318_v22  ;;  %v2975_v22 = vunpack.c.l.bf16 %v3223_v3 }
 0x418   :  { %v1654_v4 = vmul.f32 %v3320_v60, %v1649_v27  ;;  %vm1659_vm15 = vweird.f32 %v3320_v60 }
 0x419   :  { %3321 = vrcp.f32 %v1650_v29  ;;  %v1634_v30 = vpop.f32.mrf.mxu2  ;;  %v1678_v36 = vand.u32 2147483648, %v1650_v29  ;;  %v1676_v39 = vand.u32 2147483647, %v1650_v29  ;;  %vm1660_vm8 = vmor %vm1658_vm0, %vm1659_vm15  ;;  %vm1672_vm9 = vweird.f32 %v1650_v29 }
 0x41a   :  { %v1655_v45 = vsub.f32 1.0, %v1654_v4  ;;  %v2908_v4 = vunpack.c.h.bf16 %v3767_v50  ;;  %v2940_v30 = vunpack.c.h.bf16 %v3214_v23  ;;  %v1278_v50 = vpop.f32.mrf.mxu3 }
 0x41b   :  { %v1679_v44 = vor.u32 1.1754944e-38, %v1678_v36  ;;  %vm1677_vm12 = vcmp.eq.f32.partialorder %v1676_v39, 8.507059e+37  ;;  %v3230_v36 = vld [vmem:[#allocation7 + $0x3a0] sm:$0xff]  }
 0x41c   :  { %v1656_v25 = vmul.f32 %v3320_v60, %v1655_v45  ;;  %v2972_v45 = vunpack.c.h.bf16 %v3222_v24 }
 0x41e   :  { %v1657_v11 = vadd.f32 %v3320_v60, %v1656_v25  ;;  %v3213_v25 = vld [vmem:[#allocation7 + $0x318] sm:$0xff]  }
 0x41f   :  { %v3322_v31 = vpop.eup %3321 }
 0x420   :  { %v1668_v32 = vmul.f32 %v3322_v31, %v1650_v29  ;;  %vm1673_vm7 = vweird.f32 %v3322_v31  ;;  %v1661_v20 = vsel %vm1660_vm8, %v3320_v60, %v1657_v11  ;;  %v3777_v60 = vld [vmem:[#allocation6 + $0x38] sm:$0xff]   ;;  %v3231_v29 = vld [vmem:[#allocation7 + $0x3a8] sm:$0xff]  }
 0x421   :  { %vm1674_vm10 = vmor %vm1672_vm9, %vm1673_vm7  ;;  %v1666_v47 = vsel %vm1663_vm11, %v1665_v42, %v1661_v20  ;;  %v3008_v11 = vunpack.c.h.bf16 %v3231_v29  ;;  %v3007_v37 = vunpack.c.l.bf16 %v3231_v29  ;;  %v3212_v20 = vld [vmem:[#allocation7 + $0x310] sm:$0xff]   ;;  %v3004_v42 = vunpack.c.h.bf16 %v3230_v36 }
 0x422   :  { %v1669_v33 = vsub.f32 1.0, %v1668_v32  ;;  %v1709_v55 = vmul.f32 %v1666_v47, %v1626_v13  ;;  %v3232_v13 = vld [vmem:[#allocation7 + $0x3b0] sm:$0xff]   ;;  %v3221_v32 = vld [vmem:[#allocation7 + $0x358] sm:$0xff]   ;;  %v2932_v46 = vunpack.c.h.bf16 %v3212_v20 }
 0x423   :  { %v3012_v1 = vunpack.c.h.bf16 %v3232_v13  ;;  %v3011_v27 = vunpack.c.l.bf16 %v3232_v13  ;;  %v2968_v39 = vunpack.c.h.bf16 %v3221_v32  ;;  %v1576_v13 = vpop.f32.mrf.mxu0 }
 0x424   :  { %v1670_v38 = vmul.f32 %v3322_v31, %v1669_v33  ;;  %v2939_v33 = vunpack.c.l.bf16 %v3214_v23  ;;  %v2916_v23 = vunpack.c.h.bf16 %v3769_v51 }
 0x426   :  { %v1671_v41 = vadd.f32 %v3322_v31, %v1670_v38  ;;  %v2936_v38 = vunpack.c.h.bf16 %v3213_v25 }
 0x428   :  { %v1675_v26 = vsel %vm1674_vm10, %v3322_v31, %v1671_v41  ;;  %v2903_v31 = vunpack.c.l.bf16 %v3777_v60  ;;  %v3220_v41 = vld [vmem:[#allocation7 + $0x350] sm:$0xff]  }
 0x429   :  { %v1680_v48 = vsel %vm1677_vm12, %v1679_v44, %v1675_v26  ;;  %v2935_v44 = vunpack.c.l.bf16 %v3213_v25  ;;  %v2967_v26 = vunpack.c.l.bf16 %v3221_v32  ;;  %v2964_v47 = vunpack.c.h.bf16 %v3220_v41 }
 0x42a   :  { %v1710_v52 = vmul.f32 %v1680_v48, %v1629_v5  ;;  %v2944_v5 = vunpack.c.h.bf16 %v3215_v14  ;;  %v2931_v48 = vunpack.c.l.bf16 %v3212_v20  ;;  %v3218_v14 = vld [vmem:[#allocation7 + $0x340] sm:$0xff]   ;;  %v3240_v20 = vld [vmem:[#allocation7 + $0x3f8] sm:$0xff]  }
 0x42c   :  { %1752 = vmatpush.msra.mxu3 %v1710_v52  ;;  %1802 = vmatpush.msrb.mxu0 %v1710_v52 }
 0x42d   :  { %1852 = vmatpush.msrb.mxu1 %v1710_v52  ;;  %1973 = vmatpush.msrb.mxu2 %v2944_v5  ;;  %v1281_v52 = vpop.f32.mrf.mxu3  ;;  %v2912_v5 = vunpack.c.h.bf16 %v3209_v59 }
 0x42e   :  { %1753 = vmatpush.msra.mxu3 %v1709_v55  ;;  %1803 = vmatpush.msrb.mxu0 %v1709_v55  ;;  %v3239_v52 = vld [vmem:[#allocation7 + $0x3f0] sm:$0xff]  }
 0x42f   :  { %1853 = vmatpush.msrb.mxu1 %v1709_v55  ;;  %2453 = vmatmul.msk.f32.vlgmr.msra.gmra.mxu3 %vm953_vm5, %v2899_v53  ;;  %v3211_v53 = vld [vmem:[#allocation7 + $0x308] sm:$0xff]   ;;  %v2963_v55 = vunpack.c.l.bf16 %v3220_v41  ;;  %v3256_v41 = vld [vmem:[#allocation7 + $0x478] sm:$0xff]  }
 0x430   :  { %2457 = vmatmul.msk.f32.vlgmr.msrb.gmra.mxu0 %vm953_vm5, %v2907_v56  ;;  %2461 = vmatmul.msk.f32.vlgmr.msrb.gmra.mxu1 %vm953_vm5, %v2915_v58  ;;  %v3003_v56 = vunpack.c.l.bf16 %v3230_v36  ;;  %v2904_v58 = vunpack.c.h.bf16 %v3777_v60  ;;  %v2928_v62 = vunpack.c.h.bf16 %v3211_v53  ;;  %v2927_v0 = vunpack.c.l.bf16 %v3211_v53  ;;  %v3255_v53 = vld [vmem:[#allocation7 + $0x470] sm:$0xff]  }
 0x431   :  { %1998 = vmatpush.msrb.mxu3 %v2984_v2  ;;  %2027 = vmatpush.msra.mxu0 %v3016_v12  ;;  %v2960_v2 = vunpack.c.h.bf16 %v3219_v61  ;;  %v2999_v12 = vunpack.c.l.bf16 %v3229_v6  ;;  %v3043_v61 = vunpack.c.l.bf16 %v3239_v52 }
 0x432   :  { %1974 = vmatpush.msrb.mxu2 %v2943_v28 }
 0x433   :  { %1999 = vmatpush.msrb.mxu3 %v2983_v43  ;;  %2028 = vmatpush.msra.mxu0 %v3015_v17  ;;  %v2922_v43 = vld [vmem:[#allocation7 + $0x300] sm:$0xff]   ;;  %v2956_v17 = vunpack.c.h.bf16 %v3218_v14 }
 0x434   :  { %1975 = vmatpush.msrb.mxu2 %v2940_v30  ;;  %v2923_v3 = vunpack.c.l.bf16 %v2922_v43 }
 0x435   :  { %2000 = vmatpush.msrb.mxu3 %v2980_v9  ;;  %2029 = vmatpush.msra.mxu0 %v3012_v1  ;;  %v2924_v9 = vunpack.c.h.bf16 %v2922_v43 }
 0x436   :  { %1976 = vmatpush.msrb.mxu2 %v2939_v33 }
 0x437   :  { %2454 = vmatmul.msk.f32.gmra.mxu3 %vm953_vm5, %v2900_v16  ;;  %2030 = vmatpush.msra.mxu0 %v3011_v27  ;;  %v3228_v16 = vld [vmem:[#allocation7 + $0x390] sm:$0xff]   ;;  %v3226_v27 = vld [vmem:[#allocation7 + $0x380] sm:$0xff]  }
 0x438   :  { %2001 = vmatpush.msrb.mxu3 %v2979_v19  ;;  %2458 = vmatmul.msk.f32.gmra.mxu0 %vm953_vm5, %v2908_v4  ;;  %v2996_v18 = vunpack.c.h.bf16 %v3228_v16  ;;  %v2955_v19 = vunpack.c.l.bf16 %v3218_v14  ;;  %v2995_v1 = vunpack.c.l.bf16 %v3228_v16  ;;  %v2988_v60 = vunpack.c.h.bf16 %v3226_v27  ;;  %v3237_v14 = vld [vmem:[#allocation7 + $0x3e0] sm:$0xff]  }
 0x439   :  { %2031 = vmatpush.msra.mxu0 %v3008_v11  ;;  %1977 = vmatpush.msrb.mxu2 %v2936_v38  ;;  %v2987_v29 = vunpack.c.l.bf16 %v3226_v27  ;;  %v3253_v16 = vld [vmem:[#allocation7 + $0x460] sm:$0xff]  }
 0x43a   :  { %2002 = vmatpush.msrb.mxu3 %v2976_v10  ;;  %v3227_v10 = vld [vmem:[#allocation7 + $0x388] sm:$0xff]   ;;  %2462 = vmatmul.msk.f32.gmra.mxu1 %vm953_vm5, %v2916_v23  ;;  %v3236_v23 = vld [vmem:[#allocation7 + $0x3d8] sm:$0xff]  }
 0x43b   :  { %2032 = vmatpush.msra.mxu0 %v3007_v37  ;;  %1978 = vmatpush.msrb.mxu2 %v2935_v44  ;;  %v2992_v24 = vunpack.c.h.bf16 %v3227_v10  ;;  %v2991_v28 = vunpack.c.l.bf16 %v3227_v10  ;;  %v3248_v37 = vld [vmem:[#allocation7 + $0x438] sm:$0xff]   ;;  %v3112_v44 = vunpack.c.h.bf16 %v3256_v41  ;;  %v3032_v27 = vunpack.c.h.bf16 %v3236_v23 }
 0x43c   :  { %2003 = vmatpush.msrb.mxu3 %v2975_v22  ;;  %v3210_v22 = vld [vmem:[#allocation6 + $0x58] sm:$0xff]   ;;  %v3080_v38 = vunpack.c.h.bf16 %v3248_v37 }
 0x43d   :  { %2033 = vmatpush.msra.mxu0 %v3004_v42  ;;  %1979 = vmatpush.msrb.mxu2 %v2932_v46  ;;  %v2919_v4 = vunpack.c.l.bf16 %v3210_v22  ;;  %v2920_v51 = vunpack.c.h.bf16 %v3210_v22  ;;  %v3048_v42 = vunpack.c.h.bf16 %v3240_v20  ;;  %v3243_v22 = vld [vmem:[#allocation7 + $0x410] sm:$0xff]  }
 0x43e   :  { %2004 = vmatpush.msrb.mxu3 %v2972_v45 }
 0x43f   :  { %2455 = vmatmul.msk.f32.gmra.mxu3 %vm953_vm5, %v2903_v31  ;;  %1980 = vmatpush.msrb.mxu2 %v2931_v48  ;;  %v3111_v48 = vunpack.c.l.bf16 %v3256_v41  ;;  %v3234_v41 = vld [vmem:[#allocation7 + $0x3c8] sm:$0xff]  }
 0x440   :  { %2005 = vmatpush.msrb.mxu3 %v2971_v35  ;;  %2034 = vmatpush.msra.mxu0 %v3003_v56  ;;  %v3108_v56 = vunpack.c.h.bf16 %v3255_v53 }
 0x441   :  { %1981 = vmatpush.msrb.mxu2 %v2928_v62  ;;  %2459 = vmatmul.msk.f32.gmra.mxu0 %vm953_vm5, %v2911_v63  ;;  %v3107_v62 = vunpack.c.l.bf16 %v3255_v53 }
 0x442   :  { %2006 = vmatpush.msrb.mxu3 %v2968_v39  ;;  %2035 = vmatpush.msra.mxu0 %v3000_v7  ;;  %v3079_v39 = vunpack.c.l.bf16 %v3248_v37  ;;  %v3245_v7 = vld [vmem:[#allocation7 + $0x420] sm:$0xff]  }
 0x443   :  { %1982 = vmatpush.msrb.mxu2 %v2927_v0  ;;  %2463 = vmatmul.msk.f32.gmra.mxu1 %vm953_vm5, %v2919_v4  ;;  %v3238_v0 = vld [vmem:[#allocation7 + $0x3e8] sm:$0xff]   ;;  %v3067_v13 = vunpack.c.l.bf16 %v3245_v7 }
 0x444   :  { %2007 = vmatpush.msrb.mxu3 %v2967_v26  ;;  %2036 = vmatpush.msra.mxu0 %v2999_v12  ;;  %v3247_v26 = vld [vmem:[#allocation7 + $0x430] sm:$0xff]   ;;  %v3040_v6 = vunpack.c.h.bf16 %v3238_v0 }
 0x445   :  { %1983 = vmatpush.msrb.mxu2 %v2924_v9  ;;  %v3076_v46 = vunpack.c.h.bf16 %v3247_v26  ;;  %2322 = vmatpush.msra.mxu1 %v3048_v42  ;;  %v3075_v50 = vunpack.c.l.bf16 %v3247_v26  ;;  %v3039_v9 = vunpack.c.l.bf16 %v3238_v0  ;;  %v3250_v42 = vld [vmem:[#allocation7 + $0x448] sm:$0xff]   ;;  %v3024_v26 = vunpack.c.h.bf16 %v3234_v41 }
 0x446   :  { %2008 = vmatpush.msrb.mxu3 %v2964_v47  ;;  %2037 = vmatpush.msra.mxu0 %v2996_v18  ;;  %v3047_v47 = vunpack.c.l.bf16 %v3240_v20  ;;  %v3244_v18 = vld [vmem:[#allocation7 + $0x418] sm:$0xff]   ;;  %v3087_v53 = vunpack.c.l.bf16 %v3250_v42 }
 0x447   :  { %2456 = vmatmul.msk.f32.gmra.mxu3 %vm953_vm5, %v2904_v58  ;;  %1984 = vmatpush.msrb.mxu2 %v2923_v3  ;;  %v3246_v58 = vld [vmem:[#allocation7 + $0x428] sm:$0xff]   ;;  %v3036_v3 = vunpack.c.h.bf16 %v3237_v14  ;;  %v3063_v10 = vunpack.c.l.bf16 %v3244_v18 }
 0x448   :  { %2009 = vmatpush.msrb.mxu3 %v2963_v55  ;;  %2038 = vmatpush.msra.mxu0 %v2995_v1  ;;  %v3044_v55 = vunpack.c.h.bf16 %v3239_v52  ;;  %v3072_v59 = vunpack.c.h.bf16 %v3246_v58  ;;  %v3071_v63 = vunpack.c.l.bf16 %v3246_v58  ;;  %v3035_v1 = vunpack.c.l.bf16 %v3237_v14  ;;  %v3018_v58 = vld [vmem:[#allocation7 + $0x3c0] sm:$0xff]  }
 0x449   :  { %2460 = vmatmul.msk.f32.gmra.mxu0 %vm953_vm5, %v2912_v5  ;;  %2348 = vmatpush.msra.mxu2 %v3080_v38  ;;  %v3099_v5 = vunpack.c.l.bf16 %v3253_v16  ;;  %v3023_v52 = vunpack.c.l.bf16 %v3234_v41  ;;  %v3019_v0 = vunpack.c.l.bf16 %v3018_v58 }
 0x44a   :  { %2010 = vmatpush.msrb.mxu3 %v2960_v2  ;;  %2039 = vmatpush.msra.mxu0 %v2992_v24  ;;  %v3254_v2 = vld [vmem:[#allocation7 + $0x468] sm:$0xff]   ;;  %v3252_v24 = vld [vmem:[#allocation7 + $0x458] sm:$0xff]  }
 0x44b   :  { %2464 = vmatmul.msk.f32.gmra.mxu1 %vm953_vm5, %v2920_v51  ;;  %2349 = vmatpush.msra.mxu2 %v3079_v39  ;;  %v3104_v43 = vunpack.c.h.bf16 %v3254_v2  ;;  %v3103_v12 = vunpack.c.l.bf16 %v3254_v2  ;;  %v3095_v4 = vunpack.c.l.bf16 %v3252_v24  ;;  %v3273_v51 = vld [vmem:[#allocation9 + $0x4] ss:$0 sm:$0xff] }
 0x44c   :  { %2011 = vmatpush.msrb.mxu3 %v2959_v8  ;;  %2040 = vmatpush.msra.mxu0 %v2991_v28  ;;  %v3068_v8 = vunpack.c.h.bf16 %v3245_v7  ;;  %v3096_v28 = vunpack.c.h.bf16 %v3252_v24  ;;  %v2160_v24 = vand.u32 3, %v3526_v49 }
 0x44d   :  { %2350 = vmatpush.msra.mxu2 %v3076_v46  ;;  %2323 = vmatpush.msra.mxu1 %v3047_v47  ;;  %v3088_v46 = vunpack.c.h.bf16 %v3250_v42  ;;  %v3241_v47 = vld [vmem:[#allocation7 + $0x400] sm:$0xff]  }
 0x44e   :  { %2012 = vmatpush.msrb.mxu3 %v2956_v17  ;;  %2041 = vmatpush.msra.mxu0 %v2988_v60  ;;  %v3100_v17 = vunpack.c.h.bf16 %v3253_v16  ;;  %v3060_v60 = vunpack.c.h.bf16 %v3243_v22  ;;  %vm2204_vm13 = vcmp.ne.s32.totalorder %v2160_v24, 0  ;;  %vm2212_vm14 = vcmp.ne.s32.totalorder %v2160_v24, 3 }
 0x44f   :  { %2351 = vmatpush.msra.mxu2 %v3075_v50  ;;  %2324 = vmatpush.msra.mxu1 %v3044_v55  ;;  %v3052_v50 = vunpack.c.h.bf16 %v3241_v47 }
 0x450   :  { %2013 = vmatpush.msrb.mxu3 %v2955_v19  ;;  %2042 = vmatpush.msra.mxu0 %v2987_v29  ;;  %v3064_v19 = vunpack.c.h.bf16 %v3244_v18  ;;  %v3031_v29 = vunpack.c.l.bf16 %v3236_v23 }
 0x451   :  { %2352 = vmatpush.msra.mxu2 %v3072_v59  ;;  %2325 = vmatpush.msra.mxu1 %v3043_v61  ;;  %v3249_v59 = vld [vmem:[#allocation7 + $0x440] sm:$0xff]   ;;  %v3020_v61 = vunpack.c.h.bf16 %v3018_v58 }
 0x452   :  { %2374 = vmatpush.msra.mxu3 %v3112_v44  ;;  %v3083_v2 = vunpack.c.l.bf16 %v3249_v59 }
 0x453   :  { %2353 = vmatpush.msra.mxu2 %v3071_v63  ;;  %2326 = vmatpush.msra.mxu1 %v3040_v6 }
 0x454   :  { %2375 = vmatpush.msra.mxu3 %v3111_v48 }
 0x455   :  { %2354 = vmatpush.msra.mxu2 %v3068_v8  ;;  %2327 = vmatpush.msra.mxu1 %v3039_v9 }
 0x456   :  { %2376 = vmatpush.msra.mxu3 %v3108_v56  ;;  %v3051_v56 = vunpack.c.l.bf16 %v3241_v47 }
 0x457   :  { %2355 = vmatpush.msra.mxu2 %v3067_v13  ;;  %2328 = vmatpush.msra.mxu1 %v3036_v3 }
 0x458   :  { %2377 = vmatpush.msra.mxu3 %v3107_v62  ;;  %v3084_v62 = vunpack.c.h.bf16 %v3249_v59 }
 0x459   :  { %2356 = vmatpush.msra.mxu2 %v3064_v19  ;;  %2329 = vmatpush.msra.mxu1 %v3035_v1 }
 0x45a   :  { %2378 = vmatpush.msra.mxu3 %v3104_v43 }
 0x45b   :  { %2357 = vmatpush.msra.mxu2 %v3063_v10  ;;  %2330 = vmatpush.msra.mxu1 %v3032_v27 }
 0x45c   :  { %2379 = vmatpush.msra.mxu3 %v3103_v12 }
 0x45d   :  { %2358 = vmatpush.msra.mxu2 %v3060_v60  ;;  %2331 = vmatpush.msra.mxu1 %v3031_v29 }
 0x45e   :  { %2380 = vmatpush.msra.mxu3 %v3100_v17 }
 0x460   :  { %2381 = vmatpush.msra.mxu3 %v3099_v5 }
 0x462   :  { %2382 = vmatpush.msra.mxu3 %v3096_v28 }
 0x464   :  { %2383 = vmatpush.msra.mxu3 %v3095_v4 }
 0x4ad   :  { %v1805_v30 = vpop.f32.mrf.mxu0  ;;  %v1855_v45 = vpop.f32.mrf.mxu1 }
 0x4ae   :  { %2014 = vmatmul.f32.vlgmr.msrb.gmra.mxu3 %v1805_v30  ;;  %2043 = vmatmul.f32.vlgmr.msra.gmra.mxu0 %v1855_v45  ;;  %v3059_v30 = vunpack.c.l.bf16 %v3243_v22  ;;  %v3235_v45 = vld [vmem:[#allocation7 + $0x3d0] sm:$0xff]  }
 0x4af   :  { %v3027_v37 = vunpack.c.l.bf16 %v3235_v45 }
 0x4b0   :  { %2359 = vmatpush.msra.mxu2 %v3059_v30  ;;  %v2167_v30 = vand.u32 3, %v3530_v57  ;;  %v2181_v57 = vand.u32 3, %v3549_v15 }
 0x4b2   :  { %v1755_v25 = vpop.f32.mrf.mxu3  ;;  %vm2205_vm15 = vcmp.ne.s32.totalorder %v2167_v30, 0  ;;  %vm2213_vm0 = vcmp.ne.s32.totalorder %v2167_v30, 3  ;;  %vm2215_vm9 = vcmp.ne.s32.totalorder %v2181_v57, 3 }
 0x4b3   :  { %1985 = vmatmul.f32.vlgmr.msrb.gmra.mxu2 %v1755_v25  ;;  %v3251_v25 = vld [vmem:[#allocation7 + $0x450] sm:$0xff]  }
 0x4b4   :  { %v3091_v38 = vunpack.c.l.bf16 %v3251_v25 }
 0x4b5   :  { %v1808_v32 = vpop.f32.mrf.mxu0 }
 0x4b6   :  { %2017 = vmatmul.f32.gmra.mxu3 %v1808_v32  ;;  %v3092_v32 = vunpack.c.h.bf16 %v3251_v25  ;;  %v2174_v25 = vand.u32 3, %v3564_v21 }
 0x4b7   :  { %v1858_v13 = vpop.f32.mrf.mxu1 }
 0x4b8   :  { %2384 = vmatpush.msra.mxu3 %v3092_v32  ;;  %2046 = vmatmul.f32.gmra.mxu0 %v1858_v13  ;;  %vm2214_vm7 = vcmp.ne.s32.totalorder %v2174_v25, 3  ;;  %vm2206_vm8 = vcmp.ne.s32.totalorder %v2174_v25, 0 }
 0x4ba   :  { %v1758_v31 = vpop.f32.mrf.mxu3  ;;  %2385 = vmatpush.msra.mxu3 %v3091_v38 }
 0x4bb   :  { %1988 = vmatmul.f32.gmra.mxu2 %v1758_v31  ;;  %v3028_v31 = vunpack.c.h.bf16 %v3235_v45 }
 0x4bc   :  { %2386 = vmatpush.msra.mxu3 %v3088_v46 }
 0x4bd   :  { %2332 = vmatpush.msra.mxu1 %v3028_v31 }
 0x4be   :  { %v1811_v33 = vpop.f32.mrf.mxu0  ;;  %2387 = vmatpush.msra.mxu3 %v3087_v53 }
 0x4bf   :  { %2020 = vmatmul.f32.gmra.mxu3 %v1811_v33  ;;  %2333 = vmatpush.msra.mxu1 %v3027_v37 }
 0x4c0   :  { %2388 = vmatpush.msra.mxu3 %v3084_v62  ;;  %v1861_v1 = vpop.f32.mrf.mxu1 }
 0x4c1   :  { %2334 = vmatpush.msra.mxu1 %v3024_v26  ;;  %2049 = vmatmul.f32.gmra.mxu0 %v1861_v1 }
 0x4c2   :  { %v1761_v11 = vpop.f32.mrf.mxu3  ;;  %2389 = vmatpush.msra.mxu3 %v3083_v2 }
 0x4c3   :  { %1991 = vmatmul.f32.gmra.mxu2 %v1761_v11  ;;  %v3242_v11 = vld [vmem:[#allocation7 + $0x408] sm:$0xff]   ;;  %2335 = vmatpush.msra.mxu1 %v3023_v52 }
 0x4c4   :  { %v3056_v33 = vunpack.c.h.bf16 %v3242_v11  ;;  %v3055_v20 = vunpack.c.l.bf16 %v3242_v11 }
 0x4c5   :  { %2336 = vmatpush.msra.mxu1 %v3020_v61 }
 0x4c6   :  { %v1814_v36 = vpop.f32.mrf.mxu0  ;;  %2360 = vmatpush.msra.mxu2 %v3056_v33 }
 0x4c7   :  { %2023 = vmatmul.f32.gmra.mxu3 %v1814_v36  ;;  %2337 = vmatpush.msra.mxu1 %v3019_v0 }
 0x4c8   :  { %2361 = vmatpush.msra.mxu2 %v3055_v20  ;;  %v1864_v29 = vpop.f32.mrf.mxu1 }
 0x4c9   :  { %2052 = vmatmul.f32.gmra.mxu0 %v1864_v29 }
 0x4ca   :  { %v1764_v35 = vpop.f32.mrf.mxu3  ;;  %2362 = vmatpush.msra.mxu2 %v3052_v50 }
 0x4cb   :  { %1994 = vmatmul.f32.gmra.mxu2 %v1764_v35 }
 0x4cc   :  { %2363 = vmatpush.msra.mxu2 %v3051_v56 }
 0x52b   :  { %v2044_v44 = vpop.f32.mrf.mxu0 }
 0x531   :  { %v2015_v36 = vpop.f32.mrf.mxu3 }
 0x535   :  { %v2047_v33 = vpop.f32.mrf.mxu0 }
 0x536   :  { %v1986_v35 = vpop.f32.mrf.mxu2 }
 0x537   :  { %v1987_v39 = vadd.f32 %v3273_v51, %v1986_v35 }
 0x539   :  { %v2016_v48 = vadd.f32 %v2015_v36, %v1987_v39  ;;  %v2018_v7 = vpop.f32.mrf.mxu3  ;;  %v3274_v36 = vld [vmem:[#allocation9 + $0x5] ss:$0 sm:$0xff] }
 0x53b   :  { %v2045_v55 = vadd.f32 %v2044_v44, %v2016_v48 }
 0x53d   :  { %v2056_v63 = vsub.f32 0.0, %v2045_v55 }
 0x53e   :  { %v1989_v43 = vpop.f32.mrf.mxu2  ;;  %v2050_v35 = vpop.f32.mrf.mxu0 }
 0x53f   :  { %v2060_v6 = vmul.f32 1.442695, %v2056_v63 }
 0x541   :  { %3323 = vpow2.f32 %v2060_v6 }
 0x542   :  { %v2021_v31 = vpop.f32.mrf.mxu3 }
 0x546   :  { %v1992_v9 = vpop.f32.mrf.mxu2  ;;  %v2053_v37 = vpop.f32.mrf.mxu0 }
 0x547   :  { %v3324_v8 = vpop.eup %3323 }
 0x548   :  { %v2068_v12 = vadd.f32 1.0, %v3324_v8 }
 0x54a   :  { %3325 = vrcp.f32 %v2068_v12  ;;  %v2083_v17 = vand.u32 2147483648, %v2068_v12  ;;  %v2081_v19 = vand.u32 2147483647, %v2068_v12  ;;  %vm2077_vm3 = vweird.f32 %v2068_v12  ;;  %v2024_v11 = vpop.f32.mrf.mxu3 }
 0x54c   :  { %v2084_v10 = vor.u32 1.1754944e-38, %v2083_v17  ;;  %vm2082_vm6 = vcmp.eq.f32.partialorder %v2081_v19, 8.507059e+37 }
 0x54e   :  { %v1995_v21 = vpop.f32.mrf.mxu2 }
 0x550   :  { %v3326_v14 = vpop.eup %3325 }
 0x551   :  { %v2073_v16 = vmul.f32 %v3326_v14, %v2068_v12  ;;  %vm2078_vm5 = vweird.f32 %v3326_v14 }
 0x552   :  { %vm2079_vm2 = vmor %vm2077_vm3, %vm2078_vm5 }
 0x553   :  { %v2074_v3 = vsub.f32 1.0, %v2073_v16 }
 0x555   :  { %v2075_v18 = vmul.f32 %v3326_v14, %v2074_v3 }
 0x557   :  { %v2076_v5 = vadd.f32 %v3326_v14, %v2075_v18 }
 0x559   :  { %v2080_v23 = vsel %vm2079_vm2, %v3326_v14, %v2076_v5 }
 0x55a   :  { %v2085_v27 = vsel %vm2082_vm6, %v2084_v10, %v2080_v23 }
 0x55b   :  { %v2128_v28 = vmul.f32 %v2085_v27, %v2045_v55 }
 0x55d   :  { %v2140_v22 = vrot.slane %v2128_v28, 7  ;;  %v2148_v60 = vrot.slane %v2128_v28, 1  ;;  %2364 = vmatmul.f32.vlgmr.msra.gmra.mxu2 %v2128_v28 }
 0x55f   :  { %v2147_v4 = vsel %vm315_vm4, %v3739_v34, %v2140_v22  ;;  %v2154_v51 = vsel %vm324_vm1, %v2148_v60, %v3751_v54  ;;  %v2146_v45 = vsel %vm315_vm4, %v2140_v22, %v3739_v34  ;;  %vm2207_vm4 = vcmp.ne.s32.totalorder %v2181_v57, 0 }
 0x560   :  { %2465 = vmatmul.msk.f32.vlgmr.msra.gmra.mxu1 %vm2204_vm13, %v2147_v4  ;;  %2469 = vmatmul.msk.f32.vlgmr.msra.gmra.mxu3 %vm2212_vm14, %v2154_v51  ;;  %v2155_v32 = vsel %vm324_vm1, %v3751_v54, %v2148_v60 }
 0x565   :  { %2367 = vmatmul.f32.gmra.mxu2 %v3464_v40 }
 0x568   :  { %2466 = vmatmul.msk.f32.gmra.mxu1 %vm2205_vm15, %v2146_v45  ;;  %2470 = vmatmul.msk.f32.gmra.mxu3 %vm2213_vm0, %v3751_v54 }
 0x56d   :  { %2369 = vmatmul.f32.gmra.mxu2 %v3464_v40 }
 0x570   :  { %2471 = vmatmul.msk.f32.gmra.mxu3 %vm2214_vm7, %v3751_v54  ;;  %2467 = vmatmul.msk.f32.gmra.mxu1 %vm2206_vm8, %v3739_v34 }
 0x575   :  { %2371 = vmatmul.f32.gmra.mxu2 %v3464_v40 }
 0x578   :  { %2472 = vmatmul.msk.f32.gmra.mxu3 %vm2215_vm9, %v2155_v32  ;;  %2468 = vmatmul.msk.f32.gmra.mxu1 %vm2207_vm4, %v3739_v34 }
 0x5dd   :  { %v2339_v38 = vpop.f32.mrf.mxu1 }
 0x5de   :  { %v2340_v15 = vadd.f32 %v3274_v36, %v2339_v38 }
 0x5e0   :  { %v2365_v39 = vpop.f32.mrf.mxu2 }
 0x5e1   :  { %v2366_v20 = vadd.f32 %v2365_v39, %v2340_v15 }
 0x5e3   :  { %v2391_v41 = vpop.f32.mrf.mxu3 }
 0x5e4   :  { %v2392_v40 = vadd.f32 %v2391_v41, %v2366_v20 }
 0x5e5   :  { %v2342_v42 = vpop.f32.mrf.mxu1 }
 0x5e6   :  { %2401 = vst [vmem:[%s3822_s5] sm:$0xff] %v2392_v40 }
 0x5e8   :  { %v2368_v49 = vpop.f32.mrf.mxu2 }
 0x5eb   :  { %v2394_v54 = vpop.f32.mrf.mxu3 }
 0x5ed   :  { %v2344_v44 = vpop.f32.mrf.mxu1 }
 0x5f0   :  { %v2370_v34 = vpop.f32.mrf.mxu2 }
 0x5f3   :  { %v2396_v26 = vpop.f32.mrf.mxu3 }
 0x5f5   :  { %v2346_v46 = vpop.f32.mrf.mxu1 }
 0x5f8   :  { %v2372_v47 = vpop.f32.mrf.mxu2 }
 0x5fb   :  { %v2398_v48 = vpop.f32.mrf.mxu3 }
 0x5fc   :  { %2406 = vsyncpa [#allocation3], 1 }
 0x5fd   :  { %2407 = vsyncpa [#allocation5], 1 }
 0x5fe   :  { %2408 = vsyncpa [#allocation8], 1 }

</bundles_post_ra>
